<compile_context>
chip_gen: v7x
topology: tpu7x:2x2x1
jax: 0.10.0
libtpu: 0.0.40
codegen_flags: <defaults>
</compile_context>

<pallas_src>
import jax
import jax.numpy as jnp
from jax import lax
from jax.experimental import pallas as pl
from jax.experimental.pallas import tpu as pltpu

# ----- synthetic "bert-tiny" config (pretrained checkpoint not loadable) -----
HIDDEN = 32
N_HEADS = 4
HEAD_DIM = HIDDEN // N_HEADS
FFN = 128
N_LAYERS = 2
VOCAB = 100
MAX_POS = 16
SEQ = 8
BATCH = 2
LN_EPS = 1e-12  # BERT default


# --------------------------- kernel helpers ---------------------------------
def _layernorm(x, gamma, beta):
    mean = jnp.mean(x, axis=-1, keepdims=True)
    var = jnp.mean((x - mean) ** 2, axis=-1, keepdims=True)
    return (x - mean) * lax.rsqrt(var + LN_EPS) * gamma + beta


def _gelu(x):
    # tanh-approx GELU; tanh maps to the EUP on TPU.
    c = jnp.float32(0.7978845608028654)  # sqrt(2/pi)
    return 0.5 * x * (1.0 + jnp.tanh(c * (x + 0.044715 * x * x * x)))


# ------------------------------ fused kernel ---------------------------------
def bert_fused_kernel(x_ref, emb_ln_ref,
                      wqkv_ref, bqkv_ref, wo_ref, bo_ref, ln_ref,
                      wi_ref, bi_ref, w2_ref, b2_ref,
                      poolw_ref, poolb_ref, o_ref):
    # One grid step == one sequence.  x_ref: [1, S, H].
    x = _layernorm(x_ref[0], emb_ln_ref[0:1, :], emb_ln_ref[1:2, :])     # [S, H] f32

    # Static unroll over layers (neutral at N_LAYERS=2; weights stay in VMEM).
    for l in range(N_LAYERS):
        wqkv = wqkv_ref[l]      # [H, 3H] bf16  (Q block pre-scaled by 1/sqrt(HD))
        bqkv = bqkv_ref[l]      # [1, 3H] f32
        wo = wo_ref[l]          # [H, H]  bf16
        bo = bo_ref[l]          # [1, H]  f32
        ln = ln_ref[l]          # [4, H]  f32   (g1, b1, g2, b2)
        wi = wi_ref[l]          # [H, FFN] bf16
        bi = bi_ref[l]          # [1, FFN] f32
        w2 = w2_ref[l]          # [FFN, H] bf16
        b2 = b2_ref[l]          # [1, H]  f32

        # --- fused QKV: ONE wide matmul, 96 output lanes busy -----------------
        qkv = jnp.dot(x.astype(jnp.bfloat16), wqkv,
                      preferred_element_type=jnp.float32) + bqkv         # [S, 3H] f32

        # heads -> leading (batch) axis for the attention contractions
        def heads(base):
            return jnp.stack(
                [qkv[:, base + h * HEAD_DIM: base + (h + 1) * HEAD_DIM]
                 for h in range(N_HEADS)], axis=0).astype(jnp.bfloat16)   # [NH, S, HD]

        qh = heads(0)
        kh = heads(HIDDEN)
        vh = heads(2 * HIDDEN)

        # per-sequence multi-head attention; no mask needed (single sequence)
        s = jnp.einsum('nqd,nkd->nqk', qh, kh,
                       preferred_element_type=jnp.float32)                # [NH, S, S] f32
        s = s - jnp.max(s, axis=-1, keepdims=True)
        p = jnp.exp(s)
        p = p * pl.reciprocal(jnp.sum(p, axis=-1, keepdims=True), approx=True)
        ctx = jnp.einsum('nqk,nkd->nqd', p.astype(jnp.bfloat16), vh,
                         preferred_element_type=jnp.float32)              # [NH, S, HD]

        # merge heads -> ONE output projection matmul with K = H
        ctx2 = jnp.concatenate([ctx[h] for h in range(N_HEADS)], axis=1)  # [S, H]
        attn = jnp.dot(ctx2.astype(jnp.bfloat16), wo,
                       preferred_element_type=jnp.float32) + bo           # [S, H]

        h1 = _layernorm(x + attn, ln[0:1, :], ln[1:2, :])

        ff = _gelu(jnp.dot(h1.astype(jnp.bfloat16), wi,
                           preferred_element_type=jnp.float32) + bi)      # [S, FFN]
        ff = jnp.dot(ff.astype(jnp.bfloat16), w2,
                     preferred_element_type=jnp.float32) + b2             # [S, H]
        x = _layernorm(h1 + ff, ln[2:3, :], ln[3:4, :])

    # pooler (fused epilogue): tanh(W . h_CLS + b); CLS = row 0 of this sequence
    cls = x[0:1, :]                                                       # [1, H]
    o_ref[0] = jnp.tanh(jnp.dot(cls.astype(jnp.bfloat16), poolw_ref[...],
                                preferred_element_type=jnp.float32)
                        + poolb_ref[...])                                 # [1, H]


# ------------------------------ wrapper ---------------------------------------
@jax.jit
def bert_hidden_forward(token_ids, params):
    """token_ids: int32 [B, S] (already-tokenized, padded ids).
       Returns the pooled output [B, H] (== outputs[1] of BertModel)."""
    B, S = token_ids.shape
    H, L = HIDDEN, N_LAYERS

    # embedding gathers + adds stay in plain JAX (table lookup glue)
    emb = (jnp.take(params["word_emb"], token_ids, axis=0)
           + params["pos_emb"][:S][None, :, :]
           + params["type_emb"][0][None, None, :]).astype(jnp.float32)    # [B, S, H]

    in_specs = [
        pl.BlockSpec((1, S, H), lambda b: (b, 0, 0)),        # x: one sequence per step
        pl.BlockSpec((2, H), lambda b: (0, 0)),              # emb_ln
        pl.BlockSpec((L, H, 3 * H), lambda b: (0, 0, 0)),    # w_qkv  (bf16)
        pl.BlockSpec((L, 1, 3 * H), lambda b: (0, 0, 0)),    # b_qkv
        pl.BlockSpec((L, H, H), lambda b: (0, 0, 0)),        # w_o    (bf16)
        pl.BlockSpec((L, 1, H), lambda b: (0, 0, 0)),        # b_o
        pl.BlockSpec((L, 4, H), lambda b: (0, 0, 0)),        # ln_gb
        pl.BlockSpec((L, H, FFN), lambda b: (0, 0, 0)),      # w_i    (bf16)
        pl.BlockSpec((L, 1, FFN), lambda b: (0, 0, 0)),      # b_i
        pl.BlockSpec((L, FFN, H), lambda b: (0, 0, 0)),      # w_2    (bf16)
        pl.BlockSpec((L, 1, H), lambda b: (0, 0, 0)),        # b_2
        pl.BlockSpec((H, H), lambda b: (0, 0)),              # pool_w (bf16)
        pl.BlockSpec((1, H), lambda b: (0, 0)),              # pool_b
    ]

    pooled = pl.pallas_call(
        bert_fused_kernel,
        out_shape=jax.ShapeDtypeStruct((B, 1, H), jnp.float32),
        grid=(B,),
        in_specs=in_specs,
        out_specs=pl.BlockSpec((1, 1, H), lambda b: (b, 0, 0)),
        compiler_params=pltpu.CompilerParams(
            dimension_semantics=("parallel",)),   # both TCs on v7x; no-op on v5e/v6e
    )(emb, params["emb_ln"],
      params["w_qkv"], params["b_qkv"], params["w_o"], params["b_o"],
      params["ln_gb"], params["w_i"], params["b_i"], params["w_2"], params["b_2"],
      params["pool_w"], params["pool_b"])

    return pooled[:, 0, :]                                               # [B, H]


# --------------------------- deterministic init --------------------------------
def init_params(key):
    keys = jax.random.split(key, 8 + N_LAYERS)

    def nrm(k, shape):
        return (0.02 * jax.random.normal(k, shape)).astype(jnp.float32)

    scale = jnp.float32(1.0 / (HEAD_DIM ** 0.5))

    w_qkv, b_qkv, w_o, b_o, ln_gb, w_i, b_i, w_2, b_2 = ([] for _ in range(9))
    for l in range(N_LAYERS):
        lk = jax.random.split(keys[8 + l], 6)
        wq = nrm(lk[0], (HIDDEN, HIDDEN)) * scale   # fold 1/sqrt(HD) into Q weights
        wk = nrm(lk[1], (HIDDEN, HIDDEN))
        wv = nrm(lk[2], (HIDDEN, HIDDEN))
        wo = nrm(lk[3], (HIDDEN, HIDDEN))
        bq = jnp.zeros((HIDDEN,), jnp.float32) * scale
        bk = jnp.zeros((HIDDEN,), jnp.float32)
        bv = jnp.zeros((HIDDEN,), jnp.float32)

        w_qkv.append(jnp.concatenate([wq, wk, wv], axis=1).astype(jnp.bfloat16))  # [H, 3H]
        b_qkv.append(jnp.concatenate([bq, bk, bv])[None, :])                      # [1, 3H] f32
        w_o.append(wo.astype(jnp.bfloat16))                                       # [H, H]
        b_o.append(jnp.zeros((1, HIDDEN), jnp.float32))
        ln_gb.append(jnp.stack([jnp.ones(HIDDEN), jnp.zeros(HIDDEN),
                                jnp.ones(HIDDEN), jnp.zeros(HIDDEN)]
                               ).astype(jnp.float32))                             # [4, H]
        w_i.append(nrm(lk[4], (HIDDEN, FFN)).astype(jnp.bfloat16))
        b_i.append(jnp.zeros((1, FFN), jnp.float32))
        w_2.append(nrm(lk[5], (FFN, HIDDEN)).astype(jnp.bfloat16))
        b_2.append(jnp.zeros((1, HIDDEN), jnp.float32))

    return {
        "word_emb": nrm(keys[0], (VOCAB, HIDDEN)),
        "pos_emb": nrm(keys[1], (MAX_POS, HIDDEN)),
        "type_emb": nrm(keys[2], (2, HIDDEN)),
        "emb_ln": jnp.stack([jnp.ones(HIDDEN), jnp.zeros(HIDDEN)]).astype(jnp.float32),
        "pool_w": nrm(keys[3], (HIDDEN, HIDDEN)).astype(jnp.bfloat16),
        "pool_b": jnp.zeros((1, HIDDEN), jnp.float32),
        "w_qkv": jnp.stack(w_qkv), "b_qkv": jnp.stack(b_qkv),
        "w_o": jnp.stack(w_o), "b_o": jnp.stack(b_o),
        "ln_gb": jnp.stack(ln_gb),
        "w_i": jnp.stack(w_i), "b_i": jnp.stack(b_i),
        "w_2": jnp.stack(w_2), "b_2": jnp.stack(b_2),
    }


if __name__ == "__main__":
    key = jax.random.PRNGKey(0)
    k_params, k_tok = jax.random.split(key)
    params = init_params(k_params)

    # stand-in for tokenizer.encode(..., add_special_tokens=True) + padding
    token_ids = jax.random.randint(k_tok, (BATCH, SEQ), 0, VOCAB, dtype=jnp.int32)

    pooled = bert_hidden_forward(token_ids, params)   # [B, HIDDEN] pooled output
    jax.block_until_ready(pooled)
    assert pooled.shape == (BATCH, HIDDEN)
    assert bool(jnp.all(jnp.isfinite(pooled)))
    print("KERNEL_OK")
</pallas_src>

<mosaic_0001>
module attributes {stable_mosaic.version = 11 : i64} {
  func.func @bert_fused_kernel(%arg0: i32, %arg1: memref<1x8x32xf32, #tpu.memory_space<vmem>>, %arg2: memref<2x32xf32, #tpu.memory_space<vmem>>, %arg3: memref<2x32x96xbf16, #tpu.memory_space<vmem>>, %arg4: memref<2x1x96xf32, #tpu.memory_space<vmem>>, %arg5: memref<2x32x32xbf16, #tpu.memory_space<vmem>>, %arg6: memref<2x1x32xf32, #tpu.memory_space<vmem>>, %arg7: memref<2x4x32xf32, #tpu.memory_space<vmem>>, %arg8: memref<2x32x128xbf16, #tpu.memory_space<vmem>>, %arg9: memref<2x1x128xf32, #tpu.memory_space<vmem>>, %arg10: memref<2x128x32xbf16, #tpu.memory_space<vmem>>, %arg11: memref<2x1x32xf32, #tpu.memory_space<vmem>>, %arg12: memref<32x32xbf16, #tpu.memory_space<vmem>>, %arg13: memref<1x32xf32, #tpu.memory_space<vmem>>, %arg14: memref<1x1x32xf32, #tpu.memory_space<vmem>>) attributes {dimension_semantics = [#tpu.dimension_semantics<parallel>], iteration_bounds = array<i64: 2>, scalar_prefetch = 0 : i64, scratch_operands = 0 : i64, tpu.core_type = #tpu.core_type<tc>, window_params = [{transform_indices = @transform_0, window_bounds = array<i64: 1, 8, 32>}, {pipeline_mode = #tpu.pipeline_mode<synchronous>, transform_indices = @transform_1, window_bounds = array<i64: 2, 32>}, {pipeline_mode = #tpu.pipeline_mode<synchronous>, transform_indices = @transform_2, window_bounds = array<i64: 2, 32, 96>}, {pipeline_mode = #tpu.pipeline_mode<synchronous>, transform_indices = @transform_3, window_bounds = array<i64: 2, 1, 96>}, {pipeline_mode = #tpu.pipeline_mode<synchronous>, transform_indices = @transform_4, window_bounds = array<i64: 2, 32, 32>}, {pipeline_mode = #tpu.pipeline_mode<synchronous>, transform_indices = @transform_5, window_bounds = array<i64: 2, 1, 32>}, {pipeline_mode = #tpu.pipeline_mode<synchronous>, transform_indices = @transform_6, window_bounds = array<i64: 2, 4, 32>}, {pipeline_mode = #tpu.pipeline_mode<synchronous>, transform_indices = @transform_7, window_bounds = array<i64: 2, 32, 128>}, {pipeline_mode = #tpu.pipeline_mode<synchronous>, transform_indices = @transform_8, window_bounds = array<i64: 2, 1, 128>}, {pipeline_mode = #tpu.pipeline_mode<synchronous>, transform_indices = @transform_9, window_bounds = array<i64: 2, 128, 32>}, {pipeline_mode = #tpu.pipeline_mode<synchronous>, transform_indices = @transform_10, window_bounds = array<i64: 2, 1, 32>}, {pipeline_mode = #tpu.pipeline_mode<synchronous>, transform_indices = @transform_11, window_bounds = array<i64: 32, 32>}, {pipeline_mode = #tpu.pipeline_mode<synchronous>, transform_indices = @transform_12, window_bounds = array<i64: 1, 32>}, {transform_indices = @transform_13, window_bounds = array<i64: 1, 1, 32>}]} {
    %c0 = arith.constant 0 : index
    %c0_0 = arith.constant 0 : index
    %c0_1 = arith.constant 0 : index
    %0 = vector.load %arg1[%c0, %c0_0, %c0_1] : memref<1x8x32xf32, #tpu.memory_space<vmem>>, vector<1x8x32xf32>
    %1 = vector.shape_cast %0 : vector<1x8x32xf32> to vector<8x32xf32>
    %c0_2 = arith.constant 0 : index
    %c0_3 = arith.constant 0 : index
    %2 = vector.load %arg2[%c0_2, %c0_3] : memref<2x32xf32, #tpu.memory_space<vmem>>, vector<1x32xf32>
    %c1 = arith.constant 1 : index
    %c0_4 = arith.constant 0 : index
    %3 = vector.load %arg2[%c1, %c0_4] : memref<2x32xf32, #tpu.memory_space<vmem>>, vector<1x32xf32>
    %cst = arith.constant dense<0.000000e+00> : vector<8xf32>
    %4 = vector.multi_reduction <add>, %1, %cst [1] : vector<8x32xf32> to vector<8xf32>
    %5 = vector.shape_cast %4 : vector<8xf32> to vector<8x1xf32>
    %cst_5 = arith.constant 3.200000e+01 : f32
    %6 = vector.broadcast %cst_5 : f32 to vector<8x1xf32>
    %7 = arith.divf %5, %6 : vector<8x1xf32>
    %8 = vector.broadcast %7 : vector<8x1xf32> to vector<8x32xf32>
    %9 = arith.subf %1, %8 : vector<8x32xf32>
    %10 = arith.mulf %9, %9 : vector<8x32xf32>
    %cst_6 = arith.constant dense<0.000000e+00> : vector<8xf32>
    %11 = vector.multi_reduction <add>, %10, %cst_6 [1] : vector<8x32xf32> to vector<8xf32>
    %12 = vector.shape_cast %11 : vector<8xf32> to vector<8x1xf32>
    %cst_7 = arith.constant 3.200000e+01 : f32
    %13 = vector.broadcast %cst_7 : f32 to vector<8x1xf32>
    %14 = arith.divf %12, %13 : vector<8x1xf32>
    %15 = vector.broadcast %7 : vector<8x1xf32> to vector<8x32xf32>
    %16 = arith.subf %1, %15 : vector<8x32xf32>
    %cst_8 = arith.constant 9.99999996E-13 : f32
    %17 = vector.broadcast %cst_8 : f32 to vector<8x1xf32>
    %18 = arith.addf %14, %17 : vector<8x1xf32>
    %19 = math.rsqrt %18 : vector<8x1xf32>
    %20 = vector.broadcast %19 : vector<8x1xf32> to vector<8x32xf32>
    %21 = arith.mulf %16, %20 : vector<8x32xf32>
    %22 = vector.broadcast %2 : vector<1x32xf32> to vector<8x32xf32>
    %23 = arith.mulf %21, %22 : vector<8x32xf32>
    %24 = vector.broadcast %3 : vector<1x32xf32> to vector<8x32xf32>
    %25 = arith.addf %23, %24 : vector<8x32xf32>
    %c0_9 = arith.constant 0 : index
    %c0_10 = arith.constant 0 : index
    %c0_11 = arith.constant 0 : index
    %26 = vector.load %arg3[%c0_9, %c0_10, %c0_11] : memref<2x32x96xbf16, #tpu.memory_space<vmem>>, vector<1x32x96xbf16>
    %27 = vector.shape_cast %26 : vector<1x32x96xbf16> to vector<32x96xbf16>
    %c0_12 = arith.constant 0 : index
    %c0_13 = arith.constant 0 : index
    %c0_14 = arith.constant 0 : index
    %28 = vector.load %arg4[%c0_12, %c0_13, %c0_14] : memref<2x1x96xf32, #tpu.memory_space<vmem>>, vector<1x1x96xf32>
    %29 = vector.shape_cast %28 : vector<1x1x96xf32> to vector<1x96xf32>
    %c0_15 = arith.constant 0 : index
    %c0_16 = arith.constant 0 : index
    %c0_17 = arith.constant 0 : index
    %30 = vector.load %arg5[%c0_15, %c0_16, %c0_17] : memref<2x32x32xbf16, #tpu.memory_space<vmem>>, vector<1x32x32xbf16>
    %31 = vector.shape_cast %30 : vector<1x32x32xbf16> to vector<32x32xbf16>
    %c0_18 = arith.constant 0 : index
    %c0_19 = arith.constant 0 : index
    %c0_20 = arith.constant 0 : index
    %32 = vector.load %arg6[%c0_18, %c0_19, %c0_20] : memref<2x1x32xf32, #tpu.memory_space<vmem>>, vector<1x1x32xf32>
    %33 = vector.shape_cast %32 : vector<1x1x32xf32> to vector<1x32xf32>
    %c0_21 = arith.constant 0 : index
    %c0_22 = arith.constant 0 : index
    %c0_23 = arith.constant 0 : index
    %34 = vector.load %arg7[%c0_21, %c0_22, %c0_23] : memref<2x4x32xf32, #tpu.memory_space<vmem>>, vector<1x4x32xf32>
    %35 = vector.shape_cast %34 : vector<1x4x32xf32> to vector<4x32xf32>
    %c0_24 = arith.constant 0 : index
    %c0_25 = arith.constant 0 : index
    %c0_26 = arith.constant 0 : index
    %36 = vector.load %arg8[%c0_24, %c0_25, %c0_26] : memref<2x32x128xbf16, #tpu.memory_space<vmem>>, vector<1x32x128xbf16>
    %37 = vector.shape_cast %36 : vector<1x32x128xbf16> to vector<32x128xbf16>
    %c0_27 = arith.constant 0 : index
    %c0_28 = arith.constant 0 : index
    %c0_29 = arith.constant 0 : index
    %38 = vector.load %arg9[%c0_27, %c0_28, %c0_29] : memref<2x1x128xf32, #tpu.memory_space<vmem>>, vector<1x1x128xf32>
    %39 = vector.shape_cast %38 : vector<1x1x128xf32> to vector<1x128xf32>
    %c0_30 = arith.constant 0 : index
    %c0_31 = arith.constant 0 : index
    %c0_32 = arith.constant 0 : index
    %40 = vector.load %arg10[%c0_30, %c0_31, %c0_32] : memref<2x128x32xbf16, #tpu.memory_space<vmem>>, vector<1x128x32xbf16>
    %41 = vector.shape_cast %40 : vector<1x128x32xbf16> to vector<128x32xbf16>
    %c0_33 = arith.constant 0 : index
    %c0_34 = arith.constant 0 : index
    %c0_35 = arith.constant 0 : index
    %42 = vector.load %arg11[%c0_33, %c0_34, %c0_35] : memref<2x1x32xf32, #tpu.memory_space<vmem>>, vector<1x1x32xf32>
    %43 = vector.shape_cast %42 : vector<1x1x32xf32> to vector<1x32xf32>
    %44 = arith.truncf %25 : vector<8x32xf32> to vector<8x32xbf16>
    %cst_36 = arith.constant dense<0.000000e+00> : vector<8x96xf32>
    %45 = tpu.matmul %44, %27, %cst_36 {dimension_numbers = #tpu.dot_dimension_numbers<[1], [0], [0], [1], [0, 0, 1, 1], [], []>} : vector<8x32xbf16>, vector<32x96xbf16>, vector<8x96xf32> -> vector<8x96xf32>
    %46 = vector.broadcast %29 : vector<1x96xf32> to vector<8x96xf32>
    %47 = arith.addf %45, %46 : vector<8x96xf32>
    %48 = vector.extract_strided_slice %47 {offsets = [0, 0], sizes = [8, 8], strides = [1, 1]} : vector<8x96xf32> to vector<8x8xf32>
    %49 = vector.extract_strided_slice %47 {offsets = [0, 8], sizes = [8, 8], strides = [1, 1]} : vector<8x96xf32> to vector<8x8xf32>
    %50 = vector.extract_strided_slice %47 {offsets = [0, 16], sizes = [8, 8], strides = [1, 1]} : vector<8x96xf32> to vector<8x8xf32>
    %51 = vector.extract_strided_slice %47 {offsets = [0, 24], sizes = [8, 8], strides = [1, 1]} : vector<8x96xf32> to vector<8x8xf32>
    %52 = vector.shape_cast %48 : vector<8x8xf32> to vector<1x8x8xf32>
    %53 = vector.shape_cast %49 : vector<8x8xf32> to vector<1x8x8xf32>
    %54 = vector.shape_cast %50 : vector<8x8xf32> to vector<1x8x8xf32>
    %55 = vector.shape_cast %51 : vector<8x8xf32> to vector<1x8x8xf32>
    %56 = tpu.concatenate %52, %53, %54, %55 in 0 : vector<1x8x8xf32>, vector<1x8x8xf32>, vector<1x8x8xf32>, vector<1x8x8xf32> -> vector<4x8x8xf32>
    %57 = arith.truncf %56 : vector<4x8x8xf32> to vector<4x8x8xbf16>
    %58 = vector.extract_strided_slice %47 {offsets = [0, 32], sizes = [8, 8], strides = [1, 1]} : vector<8x96xf32> to vector<8x8xf32>
    %59 = vector.extract_strided_slice %47 {offsets = [0, 40], sizes = [8, 8], strides = [1, 1]} : vector<8x96xf32> to vector<8x8xf32>
    %60 = vector.extract_strided_slice %47 {offsets = [0, 48], sizes = [8, 8], strides = [1, 1]} : vector<8x96xf32> to vector<8x8xf32>
    %61 = vector.extract_strided_slice %47 {offsets = [0, 56], sizes = [8, 8], strides = [1, 1]} : vector<8x96xf32> to vector<8x8xf32>
    %62 = vector.shape_cast %58 : vector<8x8xf32> to vector<1x8x8xf32>
    %63 = vector.shape_cast %59 : vector<8x8xf32> to vector<1x8x8xf32>
    %64 = vector.shape_cast %60 : vector<8x8xf32> to vector<1x8x8xf32>
    %65 = vector.shape_cast %61 : vector<8x8xf32> to vector<1x8x8xf32>
    %66 = tpu.concatenate %62, %63, %64, %65 in 0 : vector<1x8x8xf32>, vector<1x8x8xf32>, vector<1x8x8xf32>, vector<1x8x8xf32> -> vector<4x8x8xf32>
    %67 = arith.truncf %66 : vector<4x8x8xf32> to vector<4x8x8xbf16>
    %68 = vector.extract_strided_slice %47 {offsets = [0, 64], sizes = [8, 8], strides = [1, 1]} : vector<8x96xf32> to vector<8x8xf32>
    %69 = vector.extract_strided_slice %47 {offsets = [0, 72], sizes = [8, 8], strides = [1, 1]} : vector<8x96xf32> to vector<8x8xf32>
    %70 = vector.extract_strided_slice %47 {offsets = [0, 80], sizes = [8, 8], strides = [1, 1]} : vector<8x96xf32> to vector<8x8xf32>
    %71 = vector.extract_strided_slice %47 {offsets = [0, 88], sizes = [8, 8], strides = [1, 1]} : vector<8x96xf32> to vector<8x8xf32>
    %72 = vector.shape_cast %68 : vector<8x8xf32> to vector<1x8x8xf32>
    %73 = vector.shape_cast %69 : vector<8x8xf32> to vector<1x8x8xf32>
    %74 = vector.shape_cast %70 : vector<8x8xf32> to vector<1x8x8xf32>
    %75 = vector.shape_cast %71 : vector<8x8xf32> to vector<1x8x8xf32>
    %76 = tpu.concatenate %72, %73, %74, %75 in 0 : vector<1x8x8xf32>, vector<1x8x8xf32>, vector<1x8x8xf32>, vector<1x8x8xf32> -> vector<4x8x8xf32>
    %77 = arith.truncf %76 : vector<4x8x8xf32> to vector<4x8x8xbf16>
    "tpu.trace_start"() <{level = 10 : i32, message = "nqd,nkd->nqk"}> : () -> ()
    %cst_37 = arith.constant dense<0.000000e+00> : vector<4x8x8xf32>
    %78 = tpu.matmul %57, %67, %cst_37 {dimension_numbers = #tpu.dot_dimension_numbers<[2], [2], [1], [1], [0, 0, 0, 1, 1, 1], [0], [0]>} : vector<4x8x8xbf16>, vector<4x8x8xbf16>, vector<4x8x8xf32> -> vector<4x8x8xf32>
    "tpu.trace_stop"() : () -> ()
    %cst_38 = arith.constant dense<0xFF800000> : vector<4x8xf32>
    %79 = vector.multi_reduction <maximumf>, %78, %cst_38 [2] : vector<4x8x8xf32> to vector<4x8xf32>
    %80 = vector.shape_cast %79 : vector<4x8xf32> to vector<4x8x1xf32>
    %81 = vector.broadcast %80 : vector<4x8x1xf32> to vector<4x8x8xf32>
    %82 = arith.subf %78, %81 : vector<4x8x8xf32>
    %83 = math.exp %82 : vector<4x8x8xf32>
    %cst_39 = arith.constant dense<0.000000e+00> : vector<4x8xf32>
    %84 = vector.multi_reduction <add>, %83, %cst_39 [2] : vector<4x8x8xf32> to vector<4x8xf32>
    %85 = vector.shape_cast %84 : vector<4x8xf32> to vector<4x8x1xf32>
    %86 = tpu.reciprocal %85 {approx = true} : vector<4x8x1xf32> -> vector<4x8x1xf32>
    %87 = vector.broadcast %86 : vector<4x8x1xf32> to vector<4x8x8xf32>
    %88 = arith.mulf %83, %87 : vector<4x8x8xf32>
    %89 = arith.truncf %88 : vector<4x8x8xf32> to vector<4x8x8xbf16>
    "tpu.trace_start"() <{level = 10 : i32, message = "nqk,nkd->nqd"}> : () -> ()
    %cst_40 = arith.constant dense<0.000000e+00> : vector<4x8x8xf32>
    %90 = tpu.matmul %89, %77, %cst_40 {dimension_numbers = #tpu.dot_dimension_numbers<[2], [1], [1], [2], [0, 0, 0, 1, 1, 2], [0], [0]>} : vector<4x8x8xbf16>, vector<4x8x8xbf16>, vector<4x8x8xf32> -> vector<4x8x8xf32>
    "tpu.trace_stop"() : () -> ()
    %91 = vector.extract_strided_slice %90 {offsets = [0, 0, 0], sizes = [1, 8, 8], strides = [1, 1, 1]} : vector<4x8x8xf32> to vector<1x8x8xf32>
    %92 = vector.shape_cast %91 : vector<1x8x8xf32> to vector<8x8xf32>
    %93 = vector.extract_strided_slice %90 {offsets = [1, 0, 0], sizes = [1, 8, 8], strides = [1, 1, 1]} : vector<4x8x8xf32> to vector<1x8x8xf32>
    %94 = vector.shape_cast %93 : vector<1x8x8xf32> to vector<8x8xf32>
    %95 = vector.extract_strided_slice %90 {offsets = [2, 0, 0], sizes = [1, 8, 8], strides = [1, 1, 1]} : vector<4x8x8xf32> to vector<1x8x8xf32>
    %96 = vector.shape_cast %95 : vector<1x8x8xf32> to vector<8x8xf32>
    %97 = vector.extract_strided_slice %90 {offsets = [3, 0, 0], sizes = [1, 8, 8], strides = [1, 1, 1]} : vector<4x8x8xf32> to vector<1x8x8xf32>
    %98 = vector.shape_cast %97 : vector<1x8x8xf32> to vector<8x8xf32>
    %99 = tpu.concatenate %92, %94, %96, %98 in 1 : vector<8x8xf32>, vector<8x8xf32>, vector<8x8xf32>, vector<8x8xf32> -> vector<8x32xf32>
    %100 = arith.truncf %99 : vector<8x32xf32> to vector<8x32xbf16>
    %cst_41 = arith.constant dense<0.000000e+00> : vector<8x32xf32>
    %101 = tpu.matmul %100, %31, %cst_41 {dimension_numbers = #tpu.dot_dimension_numbers<[1], [0], [0], [1], [0, 0, 1, 1], [], []>} : vector<8x32xbf16>, vector<32x32xbf16>, vector<8x32xf32> -> vector<8x32xf32>
    %102 = vector.broadcast %33 : vector<1x32xf32> to vector<8x32xf32>
    %103 = arith.addf %101, %102 : vector<8x32xf32>
    %104 = arith.addf %25, %103 : vector<8x32xf32>
    %105 = vector.extract_strided_slice %35 {offsets = [0, 0], sizes = [1, 32], strides = [1, 1]} : vector<4x32xf32> to vector<1x32xf32>
    %106 = vector.extract_strided_slice %35 {offsets = [1, 0], sizes = [1, 32], strides = [1, 1]} : vector<4x32xf32> to vector<1x32xf32>
    %cst_42 = arith.constant dense<0.000000e+00> : vector<8xf32>
    %107 = vector.multi_reduction <add>, %104, %cst_42 [1] : vector<8x32xf32> to vector<8xf32>
    %108 = vector.shape_cast %107 : vector<8xf32> to vector<8x1xf32>
    %cst_43 = arith.constant 3.200000e+01 : f32
    %109 = vector.broadcast %cst_43 : f32 to vector<8x1xf32>
    %110 = arith.divf %108, %109 : vector<8x1xf32>
    %111 = vector.broadcast %110 : vector<8x1xf32> to vector<8x32xf32>
    %112 = arith.subf %104, %111 : vector<8x32xf32>
    %113 = arith.mulf %112, %112 : vector<8x32xf32>
    %cst_44 = arith.constant dense<0.000000e+00> : vector<8xf32>
    %114 = vector.multi_reduction <add>, %113, %cst_44 [1] : vector<8x32xf32> to vector<8xf32>
    %115 = vector.shape_cast %114 : vector<8xf32> to vector<8x1xf32>
    %cst_45 = arith.constant 3.200000e+01 : f32
    %116 = vector.broadcast %cst_45 : f32 to vector<8x1xf32>
    %117 = arith.divf %115, %116 : vector<8x1xf32>
    %118 = vector.broadcast %110 : vector<8x1xf32> to vector<8x32xf32>
    %119 = arith.subf %104, %118 : vector<8x32xf32>
    %cst_46 = arith.constant 9.99999996E-13 : f32
    %120 = vector.broadcast %cst_46 : f32 to vector<8x1xf32>
    %121 = arith.addf %117, %120 : vector<8x1xf32>
    %122 = math.rsqrt %121 : vector<8x1xf32>
    %123 = vector.broadcast %122 : vector<8x1xf32> to vector<8x32xf32>
    %124 = arith.mulf %119, %123 : vector<8x32xf32>
    %125 = vector.broadcast %105 : vector<1x32xf32> to vector<8x32xf32>
    %126 = arith.mulf %124, %125 : vector<8x32xf32>
    %127 = vector.broadcast %106 : vector<1x32xf32> to vector<8x32xf32>
    %128 = arith.addf %126, %127 : vector<8x32xf32>
    %129 = arith.truncf %128 : vector<8x32xf32> to vector<8x32xbf16>
    %cst_47 = arith.constant dense<0.000000e+00> : vector<8x128xf32>
    %130 = tpu.matmul %129, %37, %cst_47 {dimension_numbers = #tpu.dot_dimension_numbers<[1], [0], [0], [1], [0, 0, 1, 1], [], []>} : vector<8x32xbf16>, vector<32x128xbf16>, vector<8x128xf32> -> vector<8x128xf32>
    %131 = vector.broadcast %39 : vector<1x128xf32> to vector<8x128xf32>
    %132 = arith.addf %130, %131 : vector<8x128xf32>
    %cst_48 = arith.constant 5.000000e-01 : f32
    %133 = vector.broadcast %cst_48 : f32 to vector<8x128xf32>
    %134 = arith.mulf %133, %132 : vector<8x128xf32>
    %cst_49 = arith.constant 4.471500e-02 : f32
    %135 = vector.broadcast %cst_49 : f32 to vector<8x128xf32>
    %136 = arith.mulf %135, %132 : vector<8x128xf32>
    %137 = arith.mulf %136, %132 : vector<8x128xf32>
    %138 = arith.mulf %137, %132 : vector<8x128xf32>
    %139 = arith.addf %132, %138 : vector<8x128xf32>
    %cst_50 = arith.constant 0.797884583 : f32
    %140 = vector.broadcast %cst_50 : f32 to vector<8x128xf32>
    %141 = arith.mulf %140, %139 : vector<8x128xf32>
    %142 = math.tanh %141 : vector<8x128xf32>
    %cst_51 = arith.constant 1.000000e+00 : f32
    %143 = vector.broadcast %cst_51 : f32 to vector<8x128xf32>
    %144 = arith.addf %143, %142 : vector<8x128xf32>
    %145 = arith.mulf %134, %144 : vector<8x128xf32>
    %146 = arith.truncf %145 : vector<8x128xf32> to vector<8x128xbf16>
    %cst_52 = arith.constant dense<0.000000e+00> : vector<8x32xf32>
    %147 = tpu.matmul %146, %41, %cst_52 {dimension_numbers = #tpu.dot_dimension_numbers<[1], [0], [0], [1], [0, 0, 1, 1], [], []>} : vector<8x128xbf16>, vector<128x32xbf16>, vector<8x32xf32> -> vector<8x32xf32>
    %148 = vector.broadcast %43 : vector<1x32xf32> to vector<8x32xf32>
    %149 = arith.addf %147, %148 : vector<8x32xf32>
    %150 = arith.addf %128, %149 : vector<8x32xf32>
    %151 = vector.extract_strided_slice %35 {offsets = [2, 0], sizes = [1, 32], strides = [1, 1]} : vector<4x32xf32> to vector<1x32xf32>
    %152 = vector.extract_strided_slice %35 {offsets = [3, 0], sizes = [1, 32], strides = [1, 1]} : vector<4x32xf32> to vector<1x32xf32>
    %cst_53 = arith.constant dense<0.000000e+00> : vector<8xf32>
    %153 = vector.multi_reduction <add>, %150, %cst_53 [1] : vector<8x32xf32> to vector<8xf32>
    %154 = vector.shape_cast %153 : vector<8xf32> to vector<8x1xf32>
    %cst_54 = arith.constant 3.200000e+01 : f32
    %155 = vector.broadcast %cst_54 : f32 to vector<8x1xf32>
    %156 = arith.divf %154, %155 : vector<8x1xf32>
    %157 = vector.broadcast %156 : vector<8x1xf32> to vector<8x32xf32>
    %158 = arith.subf %150, %157 : vector<8x32xf32>
    %159 = arith.mulf %158, %158 : vector<8x32xf32>
    %cst_55 = arith.constant dense<0.000000e+00> : vector<8xf32>
    %160 = vector.multi_reduction <add>, %159, %cst_55 [1] : vector<8x32xf32> to vector<8xf32>
    %161 = vector.shape_cast %160 : vector<8xf32> to vector<8x1xf32>
    %cst_56 = arith.constant 3.200000e+01 : f32
    %162 = vector.broadcast %cst_56 : f32 to vector<8x1xf32>
    %163 = arith.divf %161, %162 : vector<8x1xf32>
    %164 = vector.broadcast %156 : vector<8x1xf32> to vector<8x32xf32>
    %165 = arith.subf %150, %164 : vector<8x32xf32>
    %cst_57 = arith.constant 9.99999996E-13 : f32
    %166 = vector.broadcast %cst_57 : f32 to vector<8x1xf32>
    %167 = arith.addf %163, %166 : vector<8x1xf32>
    %168 = math.rsqrt %167 : vector<8x1xf32>
    %169 = vector.broadcast %168 : vector<8x1xf32> to vector<8x32xf32>
    %170 = arith.mulf %165, %169 : vector<8x32xf32>
    %171 = vector.broadcast %151 : vector<1x32xf32> to vector<8x32xf32>
    %172 = arith.mulf %170, %171 : vector<8x32xf32>
    %173 = vector.broadcast %152 : vector<1x32xf32> to vector<8x32xf32>
    %174 = arith.addf %172, %173 : vector<8x32xf32>
    %c1_58 = arith.constant 1 : index
    %c0_59 = arith.constant 0 : index
    %c0_60 = arith.constant 0 : index
    %175 = vector.load %arg3[%c1_58, %c0_59, %c0_60] : memref<2x32x96xbf16, #tpu.memory_space<vmem>>, vector<1x32x96xbf16>
    %176 = vector.shape_cast %175 : vector<1x32x96xbf16> to vector<32x96xbf16>
    %c1_61 = arith.constant 1 : index
    %c0_62 = arith.constant 0 : index
    %c0_63 = arith.constant 0 : index
    %177 = vector.load %arg4[%c1_61, %c0_62, %c0_63] : memref<2x1x96xf32, #tpu.memory_space<vmem>>, vector<1x1x96xf32>
    %178 = vector.shape_cast %177 : vector<1x1x96xf32> to vector<1x96xf32>
    %c1_64 = arith.constant 1 : index
    %c0_65 = arith.constant 0 : index
    %c0_66 = arith.constant 0 : index
    %179 = vector.load %arg5[%c1_64, %c0_65, %c0_66] : memref<2x32x32xbf16, #tpu.memory_space<vmem>>, vector<1x32x32xbf16>
    %180 = vector.shape_cast %179 : vector<1x32x32xbf16> to vector<32x32xbf16>
    %c1_67 = arith.constant 1 : index
    %c0_68 = arith.constant 0 : index
    %c0_69 = arith.constant 0 : index
    %181 = vector.load %arg6[%c1_67, %c0_68, %c0_69] : memref<2x1x32xf32, #tpu.memory_space<vmem>>, vector<1x1x32xf32>
    %182 = vector.shape_cast %181 : vector<1x1x32xf32> to vector<1x32xf32>
    %c1_70 = arith.constant 1 : index
    %c0_71 = arith.constant 0 : index
    %c0_72 = arith.constant 0 : index
    %183 = vector.load %arg7[%c1_70, %c0_71, %c0_72] : memref<2x4x32xf32, #tpu.memory_space<vmem>>, vector<1x4x32xf32>
    %184 = vector.shape_cast %183 : vector<1x4x32xf32> to vector<4x32xf32>
    %c1_73 = arith.constant 1 : index
    %c0_74 = arith.constant 0 : index
    %c0_75 = arith.constant 0 : index
    %185 = vector.load %arg8[%c1_73, %c0_74, %c0_75] : memref<2x32x128xbf16, #tpu.memory_space<vmem>>, vector<1x32x128xbf16>
    %186 = vector.shape_cast %185 : vector<1x32x128xbf16> to vector<32x128xbf16>
    %c1_76 = arith.constant 1 : index
    %c0_77 = arith.constant 0 : index
    %c0_78 = arith.constant 0 : index
    %187 = vector.load %arg9[%c1_76, %c0_77, %c0_78] : memref<2x1x128xf32, #tpu.memory_space<vmem>>, vector<1x1x128xf32>
    %188 = vector.shape_cast %187 : vector<1x1x128xf32> to vector<1x128xf32>
    %c1_79 = arith.constant 1 : index
    %c0_80 = arith.constant 0 : index
    %c0_81 = arith.constant 0 : index
    %189 = vector.load %arg10[%c1_79, %c0_80, %c0_81] : memref<2x128x32xbf16, #tpu.memory_space<vmem>>, vector<1x128x32xbf16>
    %190 = vector.shape_cast %189 : vector<1x128x32xbf16> to vector<128x32xbf16>
    %c1_82 = arith.constant 1 : index
    %c0_83 = arith.constant 0 : index
    %c0_84 = arith.constant 0 : index
    %191 = vector.load %arg11[%c1_82, %c0_83, %c0_84] : memref<2x1x32xf32, #tpu.memory_space<vmem>>, vector<1x1x32xf32>
    %192 = vector.shape_cast %191 : vector<1x1x32xf32> to vector<1x32xf32>
    %193 = arith.truncf %174 : vector<8x32xf32> to vector<8x32xbf16>
    %cst_85 = arith.constant dense<0.000000e+00> : vector<8x96xf32>
    %194 = tpu.matmul %193, %176, %cst_85 {dimension_numbers = #tpu.dot_dimension_numbers<[1], [0], [0], [1], [0, 0, 1, 1], [], []>} : vector<8x32xbf16>, vector<32x96xbf16>, vector<8x96xf32> -> vector<8x96xf32>
    %195 = vector.broadcast %178 : vector<1x96xf32> to vector<8x96xf32>
    %196 = arith.addf %194, %195 : vector<8x96xf32>
    %197 = vector.extract_strided_slice %196 {offsets = [0, 0], sizes = [8, 8], strides = [1, 1]} : vector<8x96xf32> to vector<8x8xf32>
    %198 = vector.extract_strided_slice %196 {offsets = [0, 8], sizes = [8, 8], strides = [1, 1]} : vector<8x96xf32> to vector<8x8xf32>
    %199 = vector.extract_strided_slice %196 {offsets = [0, 16], sizes = [8, 8], strides = [1, 1]} : vector<8x96xf32> to vector<8x8xf32>
    %200 = vector.extract_strided_slice %196 {offsets = [0, 24], sizes = [8, 8], strides = [1, 1]} : vector<8x96xf32> to vector<8x8xf32>
    %201 = vector.shape_cast %197 : vector<8x8xf32> to vector<1x8x8xf32>
    %202 = vector.shape_cast %198 : vector<8x8xf32> to vector<1x8x8xf32>
    %203 = vector.shape_cast %199 : vector<8x8xf32> to vector<1x8x8xf32>
    %204 = vector.shape_cast %200 : vector<8x8xf32> to vector<1x8x8xf32>
    %205 = tpu.concatenate %201, %202, %203, %204 in 0 : vector<1x8x8xf32>, vector<1x8x8xf32>, vector<1x8x8xf32>, vector<1x8x8xf32> -> vector<4x8x8xf32>
    %206 = arith.truncf %205 : vector<4x8x8xf32> to vector<4x8x8xbf16>
    %207 = vector.extract_strided_slice %196 {offsets = [0, 32], sizes = [8, 8], strides = [1, 1]} : vector<8x96xf32> to vector<8x8xf32>
    %208 = vector.extract_strided_slice %196 {offsets = [0, 40], sizes = [8, 8], strides = [1, 1]} : vector<8x96xf32> to vector<8x8xf32>
    %209 = vector.extract_strided_slice %196 {offsets = [0, 48], sizes = [8, 8], strides = [1, 1]} : vector<8x96xf32> to vector<8x8xf32>
    %210 = vector.extract_strided_slice %196 {offsets = [0, 56], sizes = [8, 8], strides = [1, 1]} : vector<8x96xf32> to vector<8x8xf32>
    %211 = vector.shape_cast %207 : vector<8x8xf32> to vector<1x8x8xf32>
    %212 = vector.shape_cast %208 : vector<8x8xf32> to vector<1x8x8xf32>
    %213 = vector.shape_cast %209 : vector<8x8xf32> to vector<1x8x8xf32>
    %214 = vector.shape_cast %210 : vector<8x8xf32> to vector<1x8x8xf32>
    %215 = tpu.concatenate %211, %212, %213, %214 in 0 : vector<1x8x8xf32>, vector<1x8x8xf32>, vector<1x8x8xf32>, vector<1x8x8xf32> -> vector<4x8x8xf32>
    %216 = arith.truncf %215 : vector<4x8x8xf32> to vector<4x8x8xbf16>
    %217 = vector.extract_strided_slice %196 {offsets = [0, 64], sizes = [8, 8], strides = [1, 1]} : vector<8x96xf32> to vector<8x8xf32>
    %218 = vector.extract_strided_slice %196 {offsets = [0, 72], sizes = [8, 8], strides = [1, 1]} : vector<8x96xf32> to vector<8x8xf32>
    %219 = vector.extract_strided_slice %196 {offsets = [0, 80], sizes = [8, 8], strides = [1, 1]} : vector<8x96xf32> to vector<8x8xf32>
    %220 = vector.extract_strided_slice %196 {offsets = [0, 88], sizes = [8, 8], strides = [1, 1]} : vector<8x96xf32> to vector<8x8xf32>
    %221 = vector.shape_cast %217 : vector<8x8xf32> to vector<1x8x8xf32>
    %222 = vector.shape_cast %218 : vector<8x8xf32> to vector<1x8x8xf32>
    %223 = vector.shape_cast %219 : vector<8x8xf32> to vector<1x8x8xf32>
    %224 = vector.shape_cast %220 : vector<8x8xf32> to vector<1x8x8xf32>
    %225 = tpu.concatenate %221, %222, %223, %224 in 0 : vector<1x8x8xf32>, vector<1x8x8xf32>, vector<1x8x8xf32>, vector<1x8x8xf32> -> vector<4x8x8xf32>
    %226 = arith.truncf %225 : vector<4x8x8xf32> to vector<4x8x8xbf16>
    "tpu.trace_start"() <{level = 10 : i32, message = "nqd,nkd->nqk"}> : () -> ()
    %cst_86 = arith.constant dense<0.000000e+00> : vector<4x8x8xf32>
    %227 = tpu.matmul %206, %216, %cst_86 {dimension_numbers = #tpu.dot_dimension_numbers<[2], [2], [1], [1], [0, 0, 0, 1, 1, 1], [0], [0]>} : vector<4x8x8xbf16>, vector<4x8x8xbf16>, vector<4x8x8xf32> -> vector<4x8x8xf32>
    "tpu.trace_stop"() : () -> ()
    %cst_87 = arith.constant dense<0xFF800000> : vector<4x8xf32>
    %228 = vector.multi_reduction <maximumf>, %227, %cst_87 [2] : vector<4x8x8xf32> to vector<4x8xf32>
    %229 = vector.shape_cast %228 : vector<4x8xf32> to vector<4x8x1xf32>
    %230 = vector.broadcast %229 : vector<4x8x1xf32> to vector<4x8x8xf32>
    %231 = arith.subf %227, %230 : vector<4x8x8xf32>
    %232 = math.exp %231 : vector<4x8x8xf32>
    %cst_88 = arith.constant dense<0.000000e+00> : vector<4x8xf32>
    %233 = vector.multi_reduction <add>, %232, %cst_88 [2] : vector<4x8x8xf32> to vector<4x8xf32>
    %234 = vector.shape_cast %233 : vector<4x8xf32> to vector<4x8x1xf32>
    %235 = tpu.reciprocal %234 {approx = true} : vector<4x8x1xf32> -> vector<4x8x1xf32>
    %236 = vector.broadcast %235 : vector<4x8x1xf32> to vector<4x8x8xf32>
    %237 = arith.mulf %232, %236 : vector<4x8x8xf32>
    %238 = arith.truncf %237 : vector<4x8x8xf32> to vector<4x8x8xbf16>
    "tpu.trace_start"() <{level = 10 : i32, message = "nqk,nkd->nqd"}> : () -> ()
    %cst_89 = arith.constant dense<0.000000e+00> : vector<4x8x8xf32>
    %239 = tpu.matmul %238, %226, %cst_89 {dimension_numbers = #tpu.dot_dimension_numbers<[2], [1], [1], [2], [0, 0, 0, 1, 1, 2], [0], [0]>} : vector<4x8x8xbf16>, vector<4x8x8xbf16>, vector<4x8x8xf32> -> vector<4x8x8xf32>
    "tpu.trace_stop"() : () -> ()
    %240 = vector.extract_strided_slice %239 {offsets = [0, 0, 0], sizes = [1, 8, 8], strides = [1, 1, 1]} : vector<4x8x8xf32> to vector<1x8x8xf32>
    %241 = vector.shape_cast %240 : vector<1x8x8xf32> to vector<8x8xf32>
    %242 = vector.extract_strided_slice %239 {offsets = [1, 0, 0], sizes = [1, 8, 8], strides = [1, 1, 1]} : vector<4x8x8xf32> to vector<1x8x8xf32>
    %243 = vector.shape_cast %242 : vector<1x8x8xf32> to vector<8x8xf32>
    %244 = vector.extract_strided_slice %239 {offsets = [2, 0, 0], sizes = [1, 8, 8], strides = [1, 1, 1]} : vector<4x8x8xf32> to vector<1x8x8xf32>
    %245 = vector.shape_cast %244 : vector<1x8x8xf32> to vector<8x8xf32>
    %246 = vector.extract_strided_slice %239 {offsets = [3, 0, 0], sizes = [1, 8, 8], strides = [1, 1, 1]} : vector<4x8x8xf32> to vector<1x8x8xf32>
    %247 = vector.shape_cast %246 : vector<1x8x8xf32> to vector<8x8xf32>
    %248 = tpu.concatenate %241, %243, %245, %247 in 1 : vector<8x8xf32>, vector<8x8xf32>, vector<8x8xf32>, vector<8x8xf32> -> vector<8x32xf32>
    %249 = arith.truncf %248 : vector<8x32xf32> to vector<8x32xbf16>
    %cst_90 = arith.constant dense<0.000000e+00> : vector<8x32xf32>
    %250 = tpu.matmul %249, %180, %cst_90 {dimension_numbers = #tpu.dot_dimension_numbers<[1], [0], [0], [1], [0, 0, 1, 1], [], []>} : vector<8x32xbf16>, vector<32x32xbf16>, vector<8x32xf32> -> vector<8x32xf32>
    %251 = vector.broadcast %182 : vector<1x32xf32> to vector<8x32xf32>
    %252 = arith.addf %250, %251 : vector<8x32xf32>
    %253 = arith.addf %174, %252 : vector<8x32xf32>
    %254 = vector.extract_strided_slice %184 {offsets = [0, 0], sizes = [1, 32], strides = [1, 1]} : vector<4x32xf32> to vector<1x32xf32>
    %255 = vector.extract_strided_slice %184 {offsets = [1, 0], sizes = [1, 32], strides = [1, 1]} : vector<4x32xf32> to vector<1x32xf32>
    %cst_91 = arith.constant dense<0.000000e+00> : vector<8xf32>
    %256 = vector.multi_reduction <add>, %253, %cst_91 [1] : vector<8x32xf32> to vector<8xf32>
    %257 = vector.shape_cast %256 : vector<8xf32> to vector<8x1xf32>
    %cst_92 = arith.constant 3.200000e+01 : f32
    %258 = vector.broadcast %cst_92 : f32 to vector<8x1xf32>
    %259 = arith.divf %257, %258 : vector<8x1xf32>
    %260 = vector.broadcast %259 : vector<8x1xf32> to vector<8x32xf32>
    %261 = arith.subf %253, %260 : vector<8x32xf32>
    %262 = arith.mulf %261, %261 : vector<8x32xf32>
    %cst_93 = arith.constant dense<0.000000e+00> : vector<8xf32>
    %263 = vector.multi_reduction <add>, %262, %cst_93 [1] : vector<8x32xf32> to vector<8xf32>
    %264 = vector.shape_cast %263 : vector<8xf32> to vector<8x1xf32>
    %cst_94 = arith.constant 3.200000e+01 : f32
    %265 = vector.broadcast %cst_94 : f32 to vector<8x1xf32>
    %266 = arith.divf %264, %265 : vector<8x1xf32>
    %267 = vector.broadcast %259 : vector<8x1xf32> to vector<8x32xf32>
    %268 = arith.subf %253, %267 : vector<8x32xf32>
    %cst_95 = arith.constant 9.99999996E-13 : f32
    %269 = vector.broadcast %cst_95 : f32 to vector<8x1xf32>
    %270 = arith.addf %266, %269 : vector<8x1xf32>
    %271 = math.rsqrt %270 : vector<8x1xf32>
    %272 = vector.broadcast %271 : vector<8x1xf32> to vector<8x32xf32>
    %273 = arith.mulf %268, %272 : vector<8x32xf32>
    %274 = vector.broadcast %254 : vector<1x32xf32> to vector<8x32xf32>
    %275 = arith.mulf %273, %274 : vector<8x32xf32>
    %276 = vector.broadcast %255 : vector<1x32xf32> to vector<8x32xf32>
    %277 = arith.addf %275, %276 : vector<8x32xf32>
    %278 = arith.truncf %277 : vector<8x32xf32> to vector<8x32xbf16>
    %cst_96 = arith.constant dense<0.000000e+00> : vector<8x128xf32>
    %279 = tpu.matmul %278, %186, %cst_96 {dimension_numbers = #tpu.dot_dimension_numbers<[1], [0], [0], [1], [0, 0, 1, 1], [], []>} : vector<8x32xbf16>, vector<32x128xbf16>, vector<8x128xf32> -> vector<8x128xf32>
    %280 = vector.broadcast %188 : vector<1x128xf32> to vector<8x128xf32>
    %281 = arith.addf %279, %280 : vector<8x128xf32>
    %cst_97 = arith.constant 5.000000e-01 : f32
    %282 = vector.broadcast %cst_97 : f32 to vector<8x128xf32>
    %283 = arith.mulf %282, %281 : vector<8x128xf32>
    %cst_98 = arith.constant 4.471500e-02 : f32
    %284 = vector.broadcast %cst_98 : f32 to vector<8x128xf32>
    %285 = arith.mulf %284, %281 : vector<8x128xf32>
    %286 = arith.mulf %285, %281 : vector<8x128xf32>
    %287 = arith.mulf %286, %281 : vector<8x128xf32>
    %288 = arith.addf %281, %287 : vector<8x128xf32>
    %cst_99 = arith.constant 0.797884583 : f32
    %289 = vector.broadcast %cst_99 : f32 to vector<8x128xf32>
    %290 = arith.mulf %289, %288 : vector<8x128xf32>
    %291 = math.tanh %290 : vector<8x128xf32>
    %cst_100 = arith.constant 1.000000e+00 : f32
    %292 = vector.broadcast %cst_100 : f32 to vector<8x128xf32>
    %293 = arith.addf %292, %291 : vector<8x128xf32>
    %294 = arith.mulf %283, %293 : vector<8x128xf32>
    %295 = arith.truncf %294 : vector<8x128xf32> to vector<8x128xbf16>
    %cst_101 = arith.constant dense<0.000000e+00> : vector<8x32xf32>
    %296 = tpu.matmul %295, %190, %cst_101 {dimension_numbers = #tpu.dot_dimension_numbers<[1], [0], [0], [1], [0, 0, 1, 1], [], []>} : vector<8x128xbf16>, vector<128x32xbf16>, vector<8x32xf32> -> vector<8x32xf32>
    %297 = vector.broadcast %192 : vector<1x32xf32> to vector<8x32xf32>
    %298 = arith.addf %296, %297 : vector<8x32xf32>
    %299 = arith.addf %277, %298 : vector<8x32xf32>
    %300 = vector.extract_strided_slice %184 {offsets = [2, 0], sizes = [1, 32], strides = [1, 1]} : vector<4x32xf32> to vector<1x32xf32>
    %301 = vector.extract_strided_slice %184 {offsets = [3, 0], sizes = [1, 32], strides = [1, 1]} : vector<4x32xf32> to vector<1x32xf32>
    %cst_102 = arith.constant dense<0.000000e+00> : vector<8xf32>
    %302 = vector.multi_reduction <add>, %299, %cst_102 [1] : vector<8x32xf32> to vector<8xf32>
    %303 = vector.shape_cast %302 : vector<8xf32> to vector<8x1xf32>
    %cst_103 = arith.constant 3.200000e+01 : f32
    %304 = vector.broadcast %cst_103 : f32 to vector<8x1xf32>
    %305 = arith.divf %303, %304 : vector<8x1xf32>
    %306 = vector.broadcast %305 : vector<8x1xf32> to vector<8x32xf32>
    %307 = arith.subf %299, %306 : vector<8x32xf32>
    %308 = arith.mulf %307, %307 : vector<8x32xf32>
    %cst_104 = arith.constant dense<0.000000e+00> : vector<8xf32>
    %309 = vector.multi_reduction <add>, %308, %cst_104 [1] : vector<8x32xf32> to vector<8xf32>
    %310 = vector.shape_cast %309 : vector<8xf32> to vector<8x1xf32>
    %cst_105 = arith.constant 3.200000e+01 : f32
    %311 = vector.broadcast %cst_105 : f32 to vector<8x1xf32>
    %312 = arith.divf %310, %311 : vector<8x1xf32>
    %313 = vector.broadcast %305 : vector<8x1xf32> to vector<8x32xf32>
    %314 = arith.subf %299, %313 : vector<8x32xf32>
    %cst_106 = arith.constant 9.99999996E-13 : f32
    %315 = vector.broadcast %cst_106 : f32 to vector<8x1xf32>
    %316 = arith.addf %312, %315 : vector<8x1xf32>
    %317 = math.rsqrt %316 : vector<8x1xf32>
    %318 = vector.broadcast %317 : vector<8x1xf32> to vector<8x32xf32>
    %319 = arith.mulf %314, %318 : vector<8x32xf32>
    %320 = vector.broadcast %300 : vector<1x32xf32> to vector<8x32xf32>
    %321 = arith.mulf %319, %320 : vector<8x32xf32>
    %322 = vector.broadcast %301 : vector<1x32xf32> to vector<8x32xf32>
    %323 = arith.addf %321, %322 : vector<8x32xf32>
    %324 = vector.extract_strided_slice %323 {offsets = [0, 0], sizes = [1, 32], strides = [1, 1]} : vector<8x32xf32> to vector<1x32xf32>
    %325 = arith.truncf %324 : vector<1x32xf32> to vector<1x32xbf16>
    %c0_107 = arith.constant 0 : index
    %c0_108 = arith.constant 0 : index
    %326 = vector.load %arg12[%c0_107, %c0_108] : memref<32x32xbf16, #tpu.memory_space<vmem>>, vector<32x32xbf16>
    %cst_109 = arith.constant dense<0.000000e+00> : vector<1x32xf32>
    %327 = tpu.matmul %325, %326, %cst_109 {dimension_numbers = #tpu.dot_dimension_numbers<[1], [0], [0], [1], [0, 0, 1, 1], [], []>} : vector<1x32xbf16>, vector<32x32xbf16>, vector<1x32xf32> -> vector<1x32xf32>
    %c0_110 = arith.constant 0 : index
    %c0_111 = arith.constant 0 : index
    %328 = vector.load %arg13[%c0_110, %c0_111] : memref<1x32xf32, #tpu.memory_space<vmem>>, vector<1x32xf32>
    %329 = arith.addf %327, %328 : vector<1x32xf32>
    %330 = math.tanh %329 : vector<1x32xf32>
    %c0_112 = arith.constant 0 : index
    %c0_113 = arith.constant 0 : index
    %c0_114 = arith.constant 0 : index
    %331 = vector.load %arg14[%c0_112, %c0_113, %c0_114] : memref<1x1x32xf32, #tpu.memory_space<vmem>>, vector<1x1x32xf32>
    %332 = vector.shape_cast %331 : vector<1x1x32xf32> to vector<1x32xf32>
    %333 = vector.shape_cast %330 : vector<1x32xf32> to vector<1x1x32xf32>
    tpu.vector_store %arg14[%c0_112, %c0_113, %c0_114], %333 {strides = array<i32>} : memref<1x1x32xf32, #tpu.memory_space<vmem>>, vector<1x1x32xf32>,
    return
  }
  func.func @transform_0(%arg0: i32) -> (i32, i32, i32) {
    %c0_i32 = arith.constant 0 : i32
    %c0_i32_0 = arith.constant 0 : i32
    %c0_i32_1 = arith.constant 0 : i32
    return %arg0, %c0_i32, %c0_i32_0 : i32, i32, i32
  }
  func.func @transform_1(%arg0: i32) -> (i32, i32) {
    %c0_i32 = arith.constant 0 : i32
    %c0_i32_0 = arith.constant 0 : i32
    %c0_i32_1 = arith.constant 0 : i32
    return %c0_i32, %c0_i32_0 : i32, i32
  }
  func.func @transform_2(%arg0: i32) -> (i32, i32, i32) {
    %c0_i32 = arith.constant 0 : i32
    %c0_i32_0 = arith.constant 0 : i32
    %c0_i32_1 = arith.constant 0 : i32
    %c0_i32_2 = arith.constant 0 : i32
    return %c0_i32, %c0_i32_0, %c0_i32_1 : i32, i32, i32
  }
  func.func @transform_3(%arg0: i32) -> (i32, i32, i32) {
    %c0_i32 = arith.constant 0 : i32
    %c0_i32_0 = arith.constant 0 : i32
    %c0_i32_1 = arith.constant 0 : i32
    %c0_i32_2 = arith.constant 0 : i32
    return %c0_i32, %c0_i32_0, %c0_i32_1 : i32, i32, i32
  }
  func.func @transform_4(%arg0: i32) -> (i32, i32, i32) {
    %c0_i32 = arith.constant 0 : i32
    %c0_i32_0 = arith.constant 0 : i32
    %c0_i32_1 = arith.constant 0 : i32
    %c0_i32_2 = arith.constant 0 : i32
    return %c0_i32, %c0_i32_0, %c0_i32_1 : i32, i32, i32
  }
  func.func @transform_5(%arg0: i32) -> (i32, i32, i32) {
    %c0_i32 = arith.constant 0 : i32
    %c0_i32_0 = arith.constant 0 : i32
    %c0_i32_1 = arith.constant 0 : i32
    %c0_i32_2 = arith.constant 0 : i32
    return %c0_i32, %c0_i32_0, %c0_i32_1 : i32, i32, i32
  }
  func.func @transform_6(%arg0: i32) -> (i32, i32, i32) {
    %c0_i32 = arith.constant 0 : i32
    %c0_i32_0 = arith.constant 0 : i32
    %c0_i32_1 = arith.constant 0 : i32
    %c0_i32_2 = arith.constant 0 : i32
    return %c0_i32, %c0_i32_0, %c0_i32_1 : i32, i32, i32
  }
  func.func @transform_7(%arg0: i32) -> (i32, i32, i32) {
    %c0_i32 = arith.constant 0 : i32
    %c0_i32_0 = arith.constant 0 : i32
    %c0_i32_1 = arith.constant 0 : i32
    %c0_i32_2 = arith.constant 0 : i32
    return %c0_i32, %c0_i32_0, %c0_i32_1 : i32, i32, i32
  }
  func.func @transform_8(%arg0: i32) -> (i32, i32, i32) {
    %c0_i32 = arith.constant 0 : i32
    %c0_i32_0 = arith.constant 0 : i32
    %c0_i32_1 = arith.constant 0 : i32
    %c0_i32_2 = arith.constant 0 : i32
    return %c0_i32, %c0_i32_0, %c0_i32_1 : i32, i32, i32
  }
  func.func @transform_9(%arg0: i32) -> (i32, i32, i32) {
    %c0_i32 = arith.constant 0 : i32
    %c0_i32_0 = arith.constant 0 : i32
    %c0_i32_1 = arith.constant 0 : i32
    %c0_i32_2 = arith.constant 0 : i32
    return %c0_i32, %c0_i32_0, %c0_i32_1 : i32, i32, i32
  }
  func.func @transform_10(%arg0: i32) -> (i32, i32, i32) {
    %c0_i32 = arith.constant 0 : i32
    %c0_i32_0 = arith.constant 0 : i32
    %c0_i32_1 = arith.constant 0 : i32
    %c0_i32_2 = arith.constant 0 : i32
    return %c0_i32, %c0_i32_0, %c0_i32_1 : i32, i32, i32
  }
  func.func @transform_11(%arg0: i32) -> (i32, i32) {
    %c0_i32 = arith.constant 0 : i32
    %c0_i32_0 = arith.constant 0 : i32
    %c0_i32_1 = arith.constant 0 : i32
    return %c0_i32, %c0_i32_0 : i32, i32
  }
  func.func @transform_12(%arg0: i32) -> (i32, i32) {
    %c0_i32 = arith.constant 0 : i32
    %c0_i32_0 = arith.constant 0 : i32
    %c0_i32_1 = arith.constant 0 : i32
    return %c0_i32, %c0_i32_0 : i32, i32
  }
  func.func @transform_13(%arg0: i32) -> (i32, i32, i32) {
    %c0_i32 = arith.constant 0 : i32
    %c0_i32_0 = arith.constant 0 : i32
    %c0_i32_1 = arith.constant 0 : i32
    return %arg0, %c0_i32, %c0_i32_0 : i32, i32, i32
  }
}

</mosaic_0001>

<bundles_post_ra>
// kernel: bert_hidden_forward.1
= control target key start
LH: loop header
LB: loop body
LE: loop exit
PB: predicated region body
PF: predicated region fallthrough
CT: control target
= control target key end

     0   :  { %s3413_s0 = inlined_call_operand.vmem [shape: f32[2,8,32], index: 0, kind: input, shape index: {}]   ;;  %s3414_s1 = inlined_call_operand.vmem [shape: f32[2,32], index: 1, kind: input, shape index: {}]   ;;  %s3415_s2 = inlined_call_operand.vmem [shape: bf16[2,32,96], index: 2, kind: input, shape index: {}]   ;;  %s3416_s3 = inlined_call_operand.vmem [shape: f32[2,1,96], index: 3, kind: input, shape index: {}]   ;;  %s3417_s4 = inlined_call_operand.vmem [shape: bf16[2,32,32], index: 4, kind: input, shape index: {}]   ;;  %s3418_s5 = inlined_call_operand.vmem [shape: f32[2,1,32], index: 5, kind: input, shape index: {}]   ;;  %s3419_s6 = inlined_call_operand.vmem [shape: f32[2,4,32], index: 6, kind: input, shape index: {}]   ;;  %s3420_s7 = inlined_call_operand.vmem [shape: bf16[2,32,128], index: 7, kind: input, shape index: {}]   ;;  %s3421_s8 = inlined_call_operand.vmem [shape: f32[2,1,128], index: 8, kind: input, shape index: {}]   ;;  %s3422_s9 = inlined_call_operand.vmem [shape: bf16[2,128,32], index: 9, kind: input, shape index: {}]   ;;  %s3423_s10 = inlined_call_operand.vmem [shape: f32[2,1,32], index: 10, kind: input, shape index: {}]   ;;  %s3424_s11 = inlined_call_operand.vmem [shape: bf16[32,32], index: 11, kind: input, shape index: {}]   ;;  %s3425_s12 = inlined_call_operand.vmem [shape: f32[1,32], index: 12, kind: input, shape index: {}]   ;;  %s3426_s13 = inlined_call_operand.hbm [shape: f32[2,1,32], index: 13, kind: output, shape index: {}]  }
   0x1   :  { %3437 = sst [smem:[#allocation5_spill]] %s3413_s0 }
   0x2   :  { %3438 = sst [smem:[#allocation6_spill]] %s3414_s1 }
   0x3   :  { %3439 = sst [smem:[#allocation7_spill]] %s3415_s2 }
   0x4   :  { %18 = vsyncpa [#allocation3], 0 }
   0x5   :  { %20 = vsyncpa [#allocation3 + $0x1], 0  ;;  %s2920_s25 = smov 0   ;;  %s2922_s26 = smov 0  }
   0x6   :  { %s2924_s27 = smov 0   ;;  %s2926_s28 = smov 0  }
   0x7 LB: > { %s2941_s29 = sadd.s32 4294967295, %s2837_s28   ;;  %s2281_s30 = sadd.s32 4294967294, %s2837_s28   ;;  %s2837_s28 = sphi %s2926_s28, %s3456_s28   ;;  %s2833_s27 = sphi %s2924_s27, %s3455_s27   ;;  %s2829_s26 = sphi %s2922_s26, %s3454_s26   ;;  %s2825_s25 = sphi %s2920_s25, %s3453_s25  }
   0x8   : > { %s2945_s14 = sadd.s32 1, %s2837_s28   ;;  %s311_s15 = sadd.s32 1, %s2833_s27 }
   0x9   : > { %s308_s16 = ssub.s32 %s2837_s28, %s2945_s14  ;;  %p321_p0 = scmp.ne.s32.totalorder %s2833_s27, %s2829_s26 }
   0xa   : > { %p309_p1 = scmp.eq.s32.totalorder %s308_s16, 0  ;;  %p322_p2 = scmp.eq.s32.totalorder %s2941_s29, 1 }
   0xb   : > { %p327_p3 = scmp.ne.s32.totalorder %s2829_s26, %s2825_s25  ;;  %p328_p4 = scmp.eq.s32.totalorder %s2281_s30, 1 }
   0xc   : > { %s2956_s17 = scalar_select %p309_p1, %s2833_s27, %s311_s15  }
   0xd   : > { %p2958_p5 = por %p322_p2, %p321_p0  ;;  %p2962_p6 = por %p328_p4, %p327_p3 }
   0xe   : > { %p2284_p7 = scmp.ge.s32.totalorder %s2837_s28, 1  ;;  %p389_p8 = scmp.lt.s32.totalorder %s2837_s28, 3 }
  0x10   : > { %p390_p9 = pnand %p2284_p7, %p389_p8 }
  0x11   : > { %p431_p10 = scmp.lt.s32.totalorder (!%p390_p9), %s2941_s29, 1  ;;  %vm439_vm0 = vcmask (!%p390_p9), 261120   ;;  %s3442_s0 = sld [smem:[#allocation5_spill]] (!%p390_p9)  ;;  %v2839_v8 = vmov (!%p390_p9), 0.0   ;;  %vm2840_vm1 = vmmov (!%p390_p9), 0   ;;  %vm576_vm2 = vcmask (!%p390_p9), 64512  }
  0x12   : > { %393 = sbr.rel (%p390_p9) target bundleno = 5836 (0x16cc), region = 72  ;;  %s3443_s2 = sld [smem:[#allocation7_spill]] (!%p390_p9)  ;;  %2456 = vmatprep.subr.bf16.mxu1 (!%p390_p9), %v2839_v8  ;;  %2470 = vmatprep.subr.bf16.mxu0 (!%p390_p9), %v2839_v8  ;;  %v2288_v20 = vld [vmem:[%s3416_s3] ss:$0 sm:$0xff] (!%p390_p9)  ;;  %vm823_vm3 = vcmask (!%p390_p9), 1043456   ;;  %vm1024_vm4 = vcmask (!%p390_p9), 130048  }
  0x13   : > { %2460 = vmatprep.mubr.msk.bf16.mxu1 (!%p390_p9), %vm2840_vm1, %v2839_v8  ;;  %2472 = vmatprep.mubr.msk.bf16.mxu0 (!%p390_p9), %vm2840_vm1, %v2839_v8  ;;  %s3444_s1 = sld [smem:[#allocation6_spill]] (!%p390_p9)  ;;  %s3434_s16 = smov (!%p390_p9), 104   ;;  %vm1026_vm5 = vcmask (!%p390_p9), 195584   ;;  %vm2211_vm6 = vcmask (!%p390_p9), 253952  }
  0x14   : > { %s3429_s22 = smov (!%p390_p9), 96   ;;  %s3427_s23 = smov (!%p390_p9), 64  }
  0x15   : > { %s3447_s30 = smov (!%p390_p9), 104   ;;  %s3448_s15 = smov (!%p390_p9), 96  }
  0x18   : > { %v2697_v7 = vld [vmem:[%s3443_s2] sm:$0xff] (!%p390_p9)   ;;  %v2698_v9 = vld [vmem:[%s3443_s2 + $0x8] sm:$0xff] (!%p390_p9)  }
  0x19   : > { %s432_s20 = scalar_select %p431_p10, %s2941_s29, 1  ;;  %2457 = vmatpush3.bf16.msra.mxu1 %v2697_v7  ;;  %v2286_v14 = vld [vmem:[%s3444_s1] ss:$0 sm:$0xff]  ;;  %v2287_v16 = vld [vmem:[%s3444_s1 + $0x1] ss:$0 sm:$0xff] }
  0x1a   : > { %2458 = vmatprep.subr.bf16.mxu1 %v2839_v8 }
  0x1b   : > { %s2285_s21 = sshll.u32 %s432_s20, 3  ;;  %s3435_s20 = smov 120  }
  0x1c   : > { %s434_s24 = scalar_lea.vmem %s3442_s0, %s2285_s21  ;;  %s3436_s21 = smov 112  }
  0x1d   : > { %v436_v0 = vld [vmem:[%s434_s24] sm:$0xff]  ;;  %2459 = vmatpush3.bf16.msra.mxu1 %v2698_v9  ;;  %s3432_s24 = smov 16  }
  0x1e   : > { %v440_v1 = vsel %vm439_vm0, %v436_v0, 0.0  ;;  %2464 = vmatprep.subr.bf16.mxu1 %v2839_v8 }
  0x1f   : > { %441 = vadd.xlane.f32.xlu0 %v440_v1 }
  0xac   : > { %v442_v2 = vpop.xlane.xlu0 %441 }
  0xad   : > { %v444_v3 = vmul.f32 0.03125, %v442_v2 }
  0xaf   : > { %v445_v4 = vsub.f32 %v436_v0, %v444_v3 }
  0xb1   : > { %v446_v5 = vmul.f32 %v445_v4, %v445_v4 }
  0xb3   : > { %v447_v6 = vsel %vm439_vm0, %v446_v5, 0.0 }
  0xb4   : > { %448 = vadd.xlane.f32.xlu0 %v447_v6 }
 0x141   : > { %v449_v10 = vpop.xlane.xlu0 %448 }
 0x142   : > { %v450_v11 = vmul.f32 0.03125, %v449_v10 }
 0x144   : > { %v451_v12 = vadd.f32 1e-12, %v450_v11 }
 0x146   : > { %2727 = vrsqrt.f32 %v451_v12 }
 0x150   : > { %v2728_v13 = vpop.eup %2727 }
 0x151   : > { %v453_v15 = vmul.f32 %v2728_v13, %v445_v4 }
 0x153   : > { %v458_v17 = vmul.f32 %v2286_v14, %v453_v15 }
 0x155   : > { %v2995_v18 = vadd.f32 %v2287_v16, %v458_v17 }
 0x157   : > { %v497_v19 = vpack.c.bf16 %v2995_v18, %v2995_v18 }
 0x159   : > { %2461 = vmatmul.mubr.msk.bf16.vlgmr.msra.gmra.mrb[0].mxu1 %vm439_vm0, %v497_v19 }
 0x15a   : > { %2466 = vmatprep.mubr.msk.bf16.mxu1 %vm2840_vm1, %v2839_v8 }
 0x22c   : > { %v553_v21 = vpop.f32.mrb[0].mxu1 }
 0x22d   : > { %v554_v22 = vadd.f32 %v2288_v20, %v553_v21  ;;  %v2462_v23 = vpop.f32.mrb[1].mxu1 }
 0x22e   : > { %v556_v24 = vpop.f32.mrb[2].mxu1 }
 0x22f   : > { %566 = vrot.lane.b32.xlu0 %v554_v22, %s3434_s16  ;;  %560 = vrot.lane.b32.xlu1 %v554_v22, %s3435_s20  ;;  %v2463_v25 = vpop.f32.mrb[3].mxu1  ;;  %v569_v26 = vpack.c.bf16 %v554_v22, %v554_v22  ;;  %s3445_s16 = smov 112  }
 0x233   : > { %563 = vrot.lane.b32.xlu1 %v554_v22, %s3436_s21  ;;  %s429_s21 = sand.u32 1, %s2829_s26  }
 0x237   : > { %574 = vrot.lane.b32.xlu1 %v569_v26, %s3429_s22 }
 0x2a1   : > { %v561_v27 = vpop.permute.xlu1 %560  ;;  %v567_v31 = vpop.permute.xlu0 %566 }
 0x2a2   : > { %v3009_v28 = vpack.c.bf16 %v561_v27, %v561_v27  ;;  %v3017_v33 = vpack.c.bf16 %v567_v31, %v567_v31 }
 0x2a4   : > { %624 = vrot.lane.b32.xlu1 %v3009_v28, %s3429_s22 }
 0x2a5   : > { %v564_v29 = vpop.permute.xlu1 %563 }
 0x2a6   : > { %v3013_v30 = vpack.c.bf16 %v564_v29, %v564_v29 }
 0x2a8   : > { %673 = vrot.lane.b32.xlu1 %v3013_v30, %s3429_s22 }
 0x2a9   : > { %v575_v32 = vpop.permute.xlu1 %574 }
 0x2aa   : > { %v581_v34 = vsel %vm576_vm2, %v575_v32, 0 }
 0x2ab   : > { %2465 = vmatpush3.bf16.xpose.msra.mxu1 %v581_v34 }
 0x2ac   : > { %722 = vrot.lane.b32.xlu1 %v3017_v33, %s3429_s22  ;;  %2476 = vmatprep.subr.bf16.mxu1 %v2839_v8  ;;  %s3433_s22 = smov 8  }
 0x2b2   : > { %2467 = vmatmul.mubr.msk.bf16.vlgmr.msra.gmra.mrb[4].mxu1 %vm576_vm2, %v569_v26 }
 0x2b3   : > { %2478 = vmatprep.mubr.msk.bf16.mxu1 %vm2840_vm1, %v2839_v8 }
 0x316   : > { %v625_v35 = vpop.permute.xlu1 %624 }
 0x317   : > { %v630_v36 = vsel %vm576_vm2, %v625_v35, 0 }
 0x318   : > { %2471 = vmatpush3.bf16.xpose.msra.mxu0 %v630_v36 }
 0x319   : > { %2482 = vmatprep.subr.bf16.mxu0 %v2839_v8 }
 0x31a   : > { %v674_v37 = vpop.permute.xlu1 %673 }
 0x31b   : > { %v679_v38 = vsel %vm576_vm2, %v674_v37, 0 }
 0x31c   : > { %2477 = vmatpush3.bf16.xpose.msra.mxu1 %v679_v38 }
 0x31d   : > { %2488 = vmatprep.subr.bf16.mxu1 %v2839_v8 }
 0x31e   : > { %v723_v39 = vpop.permute.xlu1 %722 }
 0x31f   : > { %v728_v40 = vsel %vm576_vm2, %v723_v39, 0  ;;  %2473 = vmatmul.mubr.msk.bf16.vlgmr.msra.gmra.mrb[0].mxu0 %vm576_vm2, %v3009_v28 }
 0x320   : > { %2483 = vmatpush3.bf16.xpose.msra.mxu0 %v728_v40  ;;  %2484 = vmatprep.mubr.msk.bf16.mxu0 %vm2840_vm1, %v2839_v8 }
 0x321   : > { %2494 = vmatprep.subr.bf16.mxu0 %v2839_v8 }
 0x323   : > { %2479 = vmatmul.mubr.msk.bf16.vlgmr.msra.gmra.mrb[8].mxu1 %vm576_vm2, %v3013_v30 }
 0x324   : > { %2490 = vmatprep.mubr.msk.bf16.mxu1 %vm2840_vm1, %v2839_v8 }
 0x327   : > { %2485 = vmatmul.mubr.msk.bf16.vlgmr.msra.gmra.mrb[4].mxu0 %vm576_vm2, %v3017_v33 }
 0x328   : > { %2496 = vmatprep.mubr.msk.bf16.mxu0 %vm2840_vm1, %v2839_v8 }
 0x385   : > { %v617_v41 = vpop.f32.mrb[4].mxu1 }
 0x386   : > { %v2468_v42 = vpop.f32.mrb[5].mxu1  ;;  %v770_v43 = vsel %vm576_vm2, %v617_v41, -inf }
 0x387   : > { %771 = vmax.xlane.f32.xlu1 %v770_v43  ;;  %v620_v44 = vpop.f32.mrb[6].mxu1 }
 0x388   : > { %v2469_v45 = vpop.f32.mrb[7].mxu1 }
 0x3f2   : > { %v666_v46 = vpop.f32.mrb[0].mxu0 }
 0x3f3   : > { %v2474_v47 = vpop.f32.mrb[1].mxu0  ;;  %v773_v48 = vsel %vm576_vm2, %v666_v46, -inf }
 0x3f4   : > { %774 = vmax.xlane.f32.xlu0 %v773_v48  ;;  %v669_v49 = vpop.f32.mrb[2].mxu0  ;;  %v2699_v47 = vld [vmem:[%s3417_s4] sm:$0xff]   ;;  %v2700_v48 = vld [vmem:[%s3417_s4 + $0x8] sm:$0xff]  }
 0x3f5   : > { %v2475_v50 = vpop.f32.mrb[3].mxu0 }
 0x3f6   : > { %v715_v51 = vpop.f32.mrb[8].mxu1 }
 0x3f7   : > { %v2480_v52 = vpop.f32.mrb[9].mxu1  ;;  %v776_v53 = vsel %vm576_vm2, %v715_v51, -inf }
 0x3f8   : > { %777 = vmax.xlane.f32.xlu1 %v776_v53  ;;  %v718_v54 = vpop.f32.mrb[10].mxu1 }
 0x3f9   : > { %v2481_v55 = vpop.f32.mrb[11].mxu1 }
 0x3fa   : > { %v764_v56 = vpop.f32.mrb[4].mxu0 }
 0x3fb   : > { %v2486_v57 = vpop.f32.mrb[5].mxu0  ;;  %v779_v58 = vsel %vm576_vm2, %v764_v56, -inf }
 0x3fc   : > { %780 = vmax.xlane.f32.xlu0 %v779_v58  ;;  %v767_v59 = vpop.f32.mrb[6].mxu0 }
 0x3fd   : > { %v2487_v60 = vpop.f32.mrb[7].mxu0 }
 0x409   : > { %818 = vrot.lane.b32.xlu1 %v569_v26, %s3427_s23 }
 0x414   : > { %v772_v61 = vpop.xlane.xlu1 %771 }
 0x415   : > { %v782_v62 = vsub.f32 %v617_v41, %v772_v61 }
 0x417   : > { %v786_v63 = vmul.f32 1.442695, %v782_v62 }
 0x419   : > { %2729 = vpow2.f32 %v786_v63 }
 0x423   : > { %v2730_v0 = vpop.eup %2729 }
 0x424   : > { %v794_v1 = vsel %vm576_vm2, %v2730_v0, 0.0 }
 0x42d   : > { %795 = vadd.xlane.f32.xlu1 %v794_v1 }
 0x481   : > { %v775_v2 = vpop.xlane.xlu0 %774 }
 0x482   : > { %v783_v3 = vsub.f32 %v666_v46, %v775_v2 }
 0x484   : > { %v788_v4 = vmul.f32 1.442695, %v783_v3 }
 0x485   : > { %v778_v5 = vpop.xlane.xlu1 %777 }
 0x486   : > { %2731 = vpow2.f32 %v788_v4  ;;  %v784_v6 = vsub.f32 %v715_v51, %v778_v5  ;;  %v2300_v4 = vld [vmem:[%s3418_s5] ss:$0 sm:$0xff] }
 0x488   : > { %v790_v7 = vmul.f32 1.442695, %v784_v6 }
 0x489   : > { %v781_v9 = vpop.xlane.xlu0 %780  ;;  %v819_v10 = vpop.permute.xlu1 %818 }
 0x48a   : > { %2733 = vpow2.f32 %v790_v7  ;;  %v785_v11 = vsub.f32 %v764_v56, %v781_v9  ;;  %v825_v12 = vsel %vm823_vm3, %v819_v10, 0 }
 0x48b   : > { %2489 = vmatpush3.bf16.msra.mxu1 %v825_v12 }
 0x48c   : > { %v792_v13 = vmul.f32 1.442695, %v785_v11  ;;  %2500 = vmatprep.subr.bf16.mxu1 %v2839_v8 }
 0x48e   : > { %2735 = vpow2.f32 %v792_v13 }
 0x490   : > { %v2732_v14 = vpop.eup %2731 }
 0x491   : > { %v797_v15 = vsel %vm576_vm2, %v2732_v14, 0.0 }
 0x492   : > { %798 = vadd.xlane.f32.xlu0 %v797_v15 }
 0x494   : > { %v2734_v16 = vpop.eup %2733 }
 0x495   : > { %v800_v17 = vsel %vm576_vm2, %v2734_v16, 0.0 }
 0x496   : > { %801 = vadd.xlane.f32.xlu1 %v800_v17 }
 0x498   : > { %v2736_v19 = vpop.eup %2735 }
 0x499   : > { %v803_v20 = vsel %vm576_vm2, %v2736_v19, 0.0 }
 0x49a   : > { %804 = vadd.xlane.f32.xlu0 %v803_v20  ;;  %v2703_v20 = vld [vmem:[%s3422_s9] sm:$0xff]  }
 0x4a7   : > { %915 = vrot.lane.b32.xlu1 %v3013_v30, %s3427_s23 }
 0x4ab   : > { %963 = vrot.lane.b32.xlu1 %v3017_v33, %s3427_s23 }
 0x4b0   : > { %867 = vrot.lane.b32.xlu0 %v3009_v28, %s3427_s23  ;;  %s3431_s23 = smov 24  }
 0x4ba   : > { %v796_v21 = vpop.xlane.xlu1 %795 }
 0x4bb   : > { %2737 = vrcp.f32 %v796_v21 }
 0x4c5   : > { %v2738_v22 = vpop.eup %2737 }
 0x4c6   : > { %v810_v23 = vmul.f32 %v2738_v22, %v2730_v0 }
 0x4c8   : > { %v814_v24 = vpack.c.bf16 %v810_v23, %v810_v23  ;;  %v1104_v23 = vlaneseq }
 0x4ca   : > { %2491 = vmatmul.mubr.msk.bf16.vlgmr.msra.gmra.mrb[12].mxu1 %vm576_vm2, %v814_v24 }
 0x4cb   : > { %2502 = vmatprep.mubr.msk.bf16.mxu1 %vm2840_vm1, %v2839_v8 }
 0x51f   : > { %v799_v25 = vpop.xlane.xlu0 %798 }
 0x520   : > { %2739 = vrcp.f32 %v799_v25  ;;  %v3114_v25 = vshrl.u32 %v1104_v23, 7  ;;  %v2350_v23 = vld [vmem:[%s3416_s3 + $0x1] ss:$0 sm:$0xff] }
 0x523   : > { %v802_v26 = vpop.xlane.xlu1 %801 }
 0x524   : > { %2741 = vrcp.f32 %v802_v26  ;;  %v1106_v26 = vsub.s32 0, %v3114_v25 }
 0x527   : > { %v805_v27 = vpop.xlane.xlu0 %804  ;;  %v916_v29 = vpop.permute.xlu1 %915 }
 0x528   : > { %2743 = vrcp.f32 %v805_v27  ;;  %v921_v30 = vsel %vm823_vm3, %v916_v29, 0  ;;  %v3120_v27 = vld [vmem:[%s3419_s6] sm:$0xf]  ;;  %v1111_v29 = vsub.s32 1, %v3114_v25 }
 0x529   : > { %2501 = vmatpush3.bf16.msra.mxu1 %v921_v30  ;;  %v1107_v30 = vrot.slane %v3120_v27, %v1106_v26 }
 0x52a   : > { %v2740_v28 = vpop.eup %2739  ;;  %2512 = vmatprep.subr.bf16.mxu1 %v2839_v8 }
 0x52b   : > { %v811_v31 = vmul.f32 %v2740_v28, %v2732_v14  ;;  %v868_v32 = vpop.permute.xlu0 %867  ;;  %v964_v34 = vpop.permute.xlu1 %963 }
 0x52c   : > { %v873_v33 = vsel %vm823_vm3, %v868_v32, 0  ;;  %v969_v38 = vsel %vm823_vm3, %v964_v34, 0  ;;  %v1112_v32 = vrot.slane %v3120_v27, %v1111_v29 }
 0x52d   : > { %2495 = vmatpush3.bf16.msra.mxu0 %v873_v33  ;;  %v815_v35 = vpack.c.bf16 %v811_v31, %v811_v31 }
 0x52e   : > { %v2742_v36 = vpop.eup %2741  ;;  %2506 = vmatprep.subr.bf16.mxu0 %v2839_v8 }
 0x52f   : > { %v812_v37 = vmul.f32 %v2742_v36, %v2734_v16  ;;  %v2704_v36 = vld [vmem:[%s3422_s9 + $0x8] sm:$0xff]  }
 0x530   : > { %2497 = vmatmul.mubr.msk.bf16.vlgmr.msra.gmra.mrb[8].mxu0 %vm576_vm2, %v815_v35 }
 0x531   : > { %2507 = vmatpush3.bf16.msra.mxu0 %v969_v38  ;;  %v816_v39 = vpack.c.bf16 %v812_v37, %v812_v37  ;;  %2508 = vmatprep.mubr.msk.bf16.mxu0 %vm2840_vm1, %v2839_v8  ;;  %v2705_v37 = vld [vmem:[%s3422_s9 + $0x10] sm:$0xff]   ;;  %v2706_v38 = vld [vmem:[%s3422_s9 + $0x18] sm:$0xff]  }
 0x532   : > { %v2744_v40 = vpop.eup %2743  ;;  %2520 = vmatprep.subr.bf16.mxu0 %v2839_v8 }
 0x533   : > { %v813_v41 = vmul.f32 %v2744_v40, %v2736_v19  ;;  %2503 = vmatmul.mubr.msk.bf16.vlgmr.msra.gmra.mrb[16].mxu1 %vm576_vm2, %v816_v39  ;;  %v2701_v19 = vld [vmem:[%s3420_s7] sm:$0xff]   ;;  %v2708_v40 = vld [vmem:[%s3422_s9 + $0x28] sm:$0xff]  }
 0x534   : > { %2516 = vmatprep.mubr.msk.bf16.mxu1 %vm2840_vm1, %v2839_v8  ;;  %2513 = vmatpush3.bf16.msra.mxu1 %v2699_v47  ;;  %v2707_v39 = vld [vmem:[%s3422_s9 + $0x20] sm:$0xff]  }
 0x535   : > { %v817_v42 = vpack.c.bf16 %v813_v41, %v813_v41  ;;  %2514 = vmatprep.subr.bf16.mxu1 %v2839_v8  ;;  %v2709_v41 = vld [vmem:[%s3422_s9 + $0x30] sm:$0xff]  }
 0x538   : > { %2509 = vmatmul.mubr.msk.bf16.vlgmr.msra.gmra.mrb[12].mxu0 %vm576_vm2, %v817_v42  ;;  %2515 = vmatpush3.bf16.msra.mxu1 %v2700_v48  ;;  %v2710_v42 = vld [vmem:[%s3422_s9 + $0x38] sm:$0xff]  }
 0x539   : > { %2524 = vmatprep.mubr.msk.bf16.mxu0 %vm2840_vm1, %v2839_v8  ;;  %2528 = vmatprep.subr.bf16.mxu1 %v2839_v8 }
 0x53a   : > { %2521 = vmatpush3.bf16.msra.mxu0 %v2701_v19 }
 0x53b   : > { %2522 = vmatprep.subr.bf16.mxu0 %v2839_v8 }
 0x59d   : > { %v861_v43 = vpop.f32.mrb[12].mxu1 }
 0x59e   : > { %v2492_v44 = vpop.f32.mrb[13].mxu1 }
 0x59f   : > { %v864_v45 = vpop.f32.mrb[14].mxu1 }
 0x5a0   : > { %v2493_v46 = vpop.f32.mrb[15].mxu1 }
 0x603   : > { %v909_v49 = vpop.f32.mrb[8].mxu0 }
 0x604   : > { %1012 = vrot.lane.b32.xlu0 %v909_v49, %s3433_s22  ;;  %v2498_v50 = vpop.f32.mrb[9].mxu0  ;;  %s3446_s22 = smov 120  }
 0x605   : > { %v912_v51 = vpop.f32.mrb[10].mxu0 }
 0x606   : > { %v2499_v52 = vpop.f32.mrb[11].mxu0  ;;  %v957_v53 = vpop.f32.mrb[16].mxu1 }
 0x607   : > { %1016 = vrot.lane.b32.xlu1 %v957_v53, %s3432_s24  ;;  %v2504_v54 = vpop.f32.mrb[17].mxu1  ;;  %s3449_s24 = smov 64  }
 0x608   : > { %v960_v55 = vpop.f32.mrb[18].mxu1 }
 0x609   : > { %v2505_v56 = vpop.f32.mrb[19].mxu1 }
 0x60b   : > { %v1005_v57 = vpop.f32.mrb[12].mxu0 }
 0x60c   : > { %1020 = vrot.lane.b32.xlu0 %v1005_v57, %s3431_s23  ;;  %v2510_v58 = vpop.f32.mrb[13].mxu0  ;;  %s2382_s23 = sshll.u32 %s2941_s29, 4  ;;  %s2849_s29 = smov [#allocation2]  }
 0x60d   : > { %v1008_v59 = vpop.f32.mrb[14].mxu0  ;;  %s3371_s0 = scalar_lea.hbm %s3426_s13, %s2382_s23  ;;  %s2779_s1 = sshll.u32 %s2849_s29, 4  ;;  %s2780_s1 = int_to_ptr.vmem [resolvable:$false] %s2779_s1 }
 0x60e   : > { %v2511_v60 = vpop.f32.mrb[15].mxu0  ;;  %v2308_v59 = vld [vmem:[%s3423_s10] ss:$0 sm:$0xff] }
 0x676   : > { %v1013_v61 = vpop.permute.xlu0 %1012 }
 0x677   : > { %v1023_v63 = vsel %vm576_vm2, %v861_v43, %v1013_v61  ;;  %v2304_v43 = vld [vmem:[%s3421_s8] ss:$0 sm:$0xff] }
 0x679   : > { %v1017_v62 = vpop.permute.xlu1 %1016 }
 0x67a   : > { %v1025_v0 = vsel %vm1024_vm4, %v1023_v63, %v1017_v62 }
 0x67e   : > { %v1021_v1 = vpop.permute.xlu0 %1020 }
 0x67f   : > { %v1027_v2 = vsel %vm1026_vm5, %v1025_v0, %v1021_v1 }
 0x680   : > { %v1028_v3 = vpack.c.bf16 %v1027_v2, %v1027_v2 }
 0x682   : > { %2517 = vmatmul.mubr.msk.bf16.vlgmr.msra.gmra.mrb[20].mxu1 %vm439_vm0, %v1028_v3 }
 0x683   : > { %2544 = vmatprep.mubr.msk.bf16.mxu1 %vm2840_vm1, %v2839_v8  ;;  %2529 = vmatpush3.bf16.msra.mxu1 %v2703_v20 }
 0x684   : > { %2530 = vmatprep.subr.bf16.mxu1 %v2839_v8 }
 0x687   : > { %2531 = vmatpush3.bf16.msra.mxu1 %v2704_v36 }
 0x688   : > { %2532 = vmatprep.subr.bf16.mxu1 %v2839_v8 }
 0x68b   : > { %2533 = vmatpush3.bf16.msra.mxu1 %v2705_v37 }
 0x68c   : > { %2534 = vmatprep.subr.bf16.mxu1 %v2839_v8 }
 0x68f   : > { %2535 = vmatpush3.bf16.msra.mxu1 %v2706_v38 }
 0x690   : > { %2536 = vmatprep.subr.bf16.mxu1 %v2839_v8 }
 0x693   : > { %2537 = vmatpush3.bf16.msra.mxu1 %v2707_v39 }
 0x694   : > { %2538 = vmatprep.subr.bf16.mxu1 %v2839_v8 }
 0x697   : > { %2539 = vmatpush3.bf16.msra.mxu1 %v2708_v40 }
 0x698   : > { %2540 = vmatprep.subr.bf16.mxu1 %v2839_v8 }
 0x69b   : > { %2541 = vmatpush3.bf16.msra.mxu1 %v2709_v41 }
 0x69c   : > { %2542 = vmatprep.subr.bf16.mxu1 %v2839_v8 }
 0x69f   : > { %2543 = vmatpush3.bf16.msra.mxu1 %v2710_v42 }
 0x6a0   : > { %2574 = vmatprep.subr.bf16.mxu1 %v2839_v8 }
 0x755   : > { %v1084_v5 = vpop.f32.mrb[20].mxu1 }
 0x756   : > { %v1085_v6 = vadd.f32 %v2300_v4, %v1084_v5  ;;  %v2518_v7 = vpop.f32.mrb[21].mxu1 }
 0x757   : > { %v1087_v9 = vpop.f32.mrb[22].mxu1 }
 0x758   : > { %v2519_v10 = vpop.f32.mrb[23].mxu1  ;;  %v1090_v11 = vadd.f32 %v1085_v6, %v2995_v18  ;;  %v2702_v18 = vld [vmem:[%s3420_s7 + $0x8] sm:$0xff]   ;;  %v2711_v9 = vld [vmem:[%s3443_s2 + $0x10] sm:$0xff]  }
 0x759   : > { %2523 = vmatpush3.bf16.msra.mxu0 %v2702_v18  ;;  %v2712_v10 = vld [vmem:[%s3443_s2 + $0x18] sm:$0xff]   ;;  %s2781_s2 = scalar_lea.vmem %s2780_s1, 32 }
 0x75a   : > { %v1091_v12 = vsel %vm439_vm0, %v1090_v11, 0.0  ;;  %2548 = vmatprep.subr.bf16.mxu0 %v2839_v8 }
 0x75b   : > { %1092 = vadd.xlane.f32.xlu1 %v1091_v12 }
 0x7e8   : > { %v1093_v13 = vpop.xlane.xlu1 %1092 }
 0x7e9   : > { %v1094_v14 = vmul.f32 0.03125, %v1093_v13 }
 0x7eb   : > { %v1095_v15 = vsub.f32 %v1090_v11, %v1094_v14  ;;  %v1296_v14 = vsub.s32 2, %v3114_v25 }
 0x7ed   : > { %v1096_v16 = vmul.f32 %v1095_v15, %v1095_v15 }
 0x7ef   : > { %v1097_v17 = vsel %vm439_vm0, %v1096_v16, 0.0  ;;  %v1297_v16 = vrot.slane %v3120_v27, %v1296_v14 }
 0x7f0   : > { %1098 = vadd.xlane.f32.xlu0 %v1097_v17 }
 0x87d   : > { %v1099_v21 = vpop.xlane.xlu0 %1098 }
 0x87e   : > { %v1100_v22 = vmul.f32 0.03125, %v1099_v21 }
 0x880   : > { %v1101_v24 = vadd.f32 1e-12, %v1100_v22 }
 0x882   : > { %2745 = vrsqrt.f32 %v1101_v24 }
 0x88c   : > { %v2746_v28 = vpop.eup %2745 }
 0x88d   : > { %v1103_v31 = vmul.f32 %v2746_v28, %v1095_v15  ;;  %v1301_v15 = vsub.s32 3, %v3114_v25 }
 0x88f   : > { %v1108_v33 = vmul.f32 %v1107_v30, %v1103_v31  ;;  %v1302_v18 = vrot.slane %v3120_v27, %v1301_v15 }
 0x891   : > { %v1113_v34 = vadd.f32 %v1112_v32, %v1108_v33 }
 0x893   : > { %v1114_v35 = vpack.c.bf16 %v1113_v34, %v1113_v34 }
 0x895   : > { %2525 = vmatmul.mubr.msk.bf16.vlgmr.msra.gmra.mrb[16].mxu0 %vm439_vm0, %v1114_v35 }
 0x896   : > { %2552 = vmatprep.mubr.msk.bf16.mxu0 %vm2840_vm1, %v2839_v8  ;;  %2549 = vmatpush3.bf16.msra.mxu0 %v2711_v9 }
 0x897   : > { %2550 = vmatprep.subr.bf16.mxu0 %v2839_v8 }
 0x89a   : > { %2551 = vmatpush3.bf16.msra.mxu0 %v2712_v10 }
 0x89b   : > { %2556 = vmatprep.subr.bf16.mxu0 %v2839_v8 }
 0x968   : > { %v1170_v44 = vpop.f32.mrb[16].mxu0 }
 0x969   : > { %v1171_v45 = vadd.f32 %v2304_v43, %v1170_v44  ;;  %v2526_v46 = vpop.f32.mrb[17].mxu0 }
 0x96a   : > { %v1173_v47 = vpop.f32.mrb[18].mxu0 }
 0x96b   : > { %v1177_v48 = vmul.f32 0.044715, %v1171_v45  ;;  %v2527_v49 = vpop.f32.mrb[19].mxu0  ;;  %v1176_v55 = vmul.f32 0.5, %v1171_v45 }
 0x96d   : > { %v1178_v50 = vmul.f32 %v1177_v48, %v1171_v45 }
 0x96f   : > { %v1179_v51 = vmul.f32 %v1178_v50, %v1171_v45 }
 0x971   : > { %v1180_v52 = vadd.f32 %v1179_v51, %v1171_v45 }
 0x973   : > { %v1181_v53 = vmul.f32 0.7978846, %v1180_v52 }
 0x975   : > { %2747 = vtanh.f32 %v1181_v53 }
 0x97f   : > { %v2748_v54 = vpop.eup %2747 }
 0x980   : > { %v1183_v56 = vadd.f32 1.0, %v2748_v54 }
 0x982   : > { %v1184_v57 = vmul.f32 %v1183_v56, %v1176_v55 }
 0x984   : > { %v1185_v58 = vpack.c.bf16 %v1184_v57, %v1184_v57 }
 0x986   : > { %2545 = vmatmul.mubr.bf16.vlgmr.msra.gmra.mrb[24].mxu1 %v1185_v58 }
 0x987   : > { %2576 = vmatprep.mubr.msk.bf16.mxu1 %vm2840_vm1, %v2839_v8 }
 0xa59   : > { %v1274_v60 = vpop.f32.mrb[24].mxu1 }
 0xa5a   : > { %v1275_v61 = vadd.f32 %v2308_v59, %v1274_v60  ;;  %v2546_v62 = vpop.f32.mrb[25].mxu1 }
 0xa5b   : > { %v1277_v63 = vpop.f32.mrb[26].mxu1 }
 0xa5c   : > { %v2547_v0 = vpop.f32.mrb[27].mxu1  ;;  %v1280_v1 = vadd.f32 %v1275_v61, %v1113_v34 }
 0xa5e   : > { %v1281_v2 = vsel %vm439_vm0, %v1280_v1, 0.0 }
 0xa5f   : > { %1282 = vadd.xlane.f32.xlu0 %v1281_v2 }
 0xaec   : > { %v1283_v3 = vpop.xlane.xlu0 %1282 }
 0xaed   : > { %v1284_v4 = vmul.f32 0.03125, %v1283_v3 }
 0xaef   : > { %v1285_v5 = vsub.f32 %v1280_v1, %v1284_v4 }
 0xaf1   : > { %v1286_v6 = vmul.f32 %v1285_v5, %v1285_v5 }
 0xaf3   : > { %v1287_v7 = vsel %vm439_vm0, %v1286_v6, 0.0 }
 0xaf4   : > { %1288 = vadd.xlane.f32.xlu1 %v1287_v7 }
 0xb81   : > { %v1289_v11 = vpop.xlane.xlu1 %1288 }
 0xb82   : > { %v1290_v12 = vmul.f32 0.03125, %v1289_v11 }
 0xb84   : > { %v1291_v13 = vadd.f32 1e-12, %v1290_v12 }
 0xb86   : > { %2749 = vrsqrt.f32 %v1291_v13 }
 0xb90   : > { %v2750_v17 = vpop.eup %2749 }
 0xb91   : > { %v1293_v19 = vmul.f32 %v2750_v17, %v1285_v5 }
 0xb93   : > { %v1298_v20 = vmul.f32 %v1297_v16, %v1293_v19 }
 0xb95   : > { %v3186_v21 = vadd.f32 %v1302_v18, %v1298_v20 }
 0xb97   : > { %v1346_v22 = vpack.c.bf16 %v3186_v21, %v3186_v21 }
 0xb99   : > { %2553 = vmatmul.mubr.msk.bf16.vlgmr.msra.gmra.mrb[20].mxu0 %vm439_vm0, %v1346_v22 }
 0xb9a   : > { %2558 = vmatprep.mubr.msk.bf16.mxu0 %vm2840_vm1, %v2839_v8 }
 0xc6c   : > { %v1402_v24 = vpop.f32.mrb[20].mxu0 }
 0xc6d   : > { %v1403_v30 = vadd.f32 %v2350_v23, %v1402_v24  ;;  %v2554_v28 = vpop.f32.mrb[21].mxu0 }
 0xc6e   : > { %v1405_v31 = vpop.f32.mrb[22].mxu0 }
 0xc6f   : > { %1412 = vrot.lane.b32.xlu1 %v1403_v30, %s3445_s16  ;;  %1409 = vrot.lane.b32.xlu0 %v1403_v30, %s3446_s22  ;;  %v2555_v27 = vpop.f32.mrb[23].mxu0  ;;  %v1418_v32 = vpack.c.bf16 %v1403_v30, %v1403_v30  ;;  %s3450_s22 = smov 8   ;;  %s430_s16 = scalar_lea.vmem [#allocation2], %s429_s21 }
 0xc73   : > { %1415 = vrot.lane.b32.xlu1 %v1403_v30, %s3447_s30  ;;  %1423 = vrot.lane.b32.xlu0 %v1418_v32, %s3448_s15  ;;  %s3451_s30 = smov 16  }
 0xce1   : > { %v1413_v33 = vpop.permute.xlu1 %1412  ;;  %v1410_v34 = vpop.permute.xlu0 %1409 }
 0xce2   : > { %v1420_v35 = vpack.c.bf16 %v1413_v33, %v1413_v33  ;;  %v3200_v36 = vpack.c.bf16 %v1410_v34, %v1410_v34 }
 0xce4   : > { %1472 = vrot.lane.b32.xlu1 %v3200_v36, %s3448_s15  ;;  %1521 = vrot.lane.b32.xlu0 %v1420_v35, %s3448_s15 }
 0xce5   : > { %v1416_v37 = vpop.permute.xlu1 %1415  ;;  %v1424_v38 = vpop.permute.xlu0 %1423 }
 0xce6   : > { %v3205_v39 = vpack.c.bf16 %v1416_v37, %v1416_v37  ;;  %v1429_v40 = vsel %vm576_vm2, %v1424_v38, 0 }
 0xce7   : > { %2557 = vmatpush3.bf16.xpose.msra.mxu0 %v1429_v40 }
 0xce8   : > { %1570 = vrot.lane.b32.xlu1 %v3205_v39, %s3448_s15  ;;  %2562 = vmatprep.subr.bf16.mxu0 %v2839_v8  ;;  %s3452_s15 = smov 24  }
 0xcee   : > { %2559 = vmatmul.mubr.msk.bf16.vlgmr.msra.gmra.mrb[24].mxu0 %vm576_vm2, %v1418_v32 }
 0xcef   : > { %2564 = vmatprep.mubr.msk.bf16.mxu0 %vm2840_vm1, %v2839_v8 }
 0xd56   : > { %v1473_v41 = vpop.permute.xlu1 %1472  ;;  %v1522_v45 = vpop.permute.xlu0 %1521 }
 0xd57   : > { %v1478_v42 = vsel %vm576_vm2, %v1473_v41, 0  ;;  %v1527_v46 = vsel %vm576_vm2, %v1522_v45, 0 }
 0xd58   : > { %2563 = vmatpush3.bf16.xpose.msra.mxu0 %v1478_v42 }
 0xd59   : > { %2568 = vmatprep.subr.bf16.mxu0 %v2839_v8 }
 0xd5a   : > { %v1571_v43 = vpop.permute.xlu1 %1570 }
 0xd5b   : > { %v1576_v44 = vsel %vm576_vm2, %v1571_v43, 0 }
 0xd5c   : > { %2575 = vmatpush3.bf16.xpose.msra.mxu1 %v1576_v44 }
 0xd5d   : > { %2586 = vmatprep.subr.bf16.mxu1 %v2839_v8 }
 0xd5f   : > { %2565 = vmatmul.mubr.msk.bf16.vlgmr.msra.gmra.mrb[28].mxu0 %vm576_vm2, %v3200_v36 }
 0xd60   : > { %2569 = vmatpush3.bf16.xpose.msra.mxu0 %v1527_v46  ;;  %2570 = vmatprep.mubr.msk.bf16.mxu0 %vm2840_vm1, %v2839_v8 }
 0xd61   : > { %2580 = vmatprep.subr.bf16.mxu0 %v2839_v8 }
 0xd63   : > { %2577 = vmatmul.mubr.msk.bf16.vlgmr.msra.gmra.mrb[28].mxu1 %vm576_vm2, %v3205_v39 }
 0xd64   : > { %2588 = vmatprep.mubr.msk.bf16.mxu1 %vm2840_vm1, %v2839_v8 }
 0xd67   : > { %2571 = vmatmul.mubr.msk.bf16.vlgmr.msra.gmra.mrb[32].mxu0 %vm576_vm2, %v1420_v35 }
 0xd68   : > { %2582 = vmatprep.mubr.msk.bf16.mxu0 %vm2840_vm1, %v2839_v8 }
 0xdc1   : > { %v1465_v47 = vpop.f32.mrb[24].mxu0 }
 0xdc2   : > { %v2560_v48 = vpop.f32.mrb[25].mxu0  ;;  %v1618_v49 = vsel %vm576_vm2, %v1465_v47, -inf }
 0xdc3   : > { %1619 = vmax.xlane.f32.xlu0 %v1618_v49  ;;  %v1468_v50 = vpop.f32.mrb[26].mxu0 }
 0xdc4   : > { %v2561_v51 = vpop.f32.mrb[27].mxu0 }
 0xe32   : > { %v1514_v52 = vpop.f32.mrb[28].mxu0 }
 0xe33   : > { %v2566_v53 = vpop.f32.mrb[29].mxu0  ;;  %v1621_v54 = vsel %vm576_vm2, %v1514_v52, -inf }
 0xe34   : > { %1622 = vmax.xlane.f32.xlu1 %v1621_v54  ;;  %v1517_v55 = vpop.f32.mrb[30].mxu0 }
 0xe35   : > { %v2567_v56 = vpop.f32.mrb[31].mxu0 }
 0xe36   : > { %v1612_v57 = vpop.f32.mrb[28].mxu1 }
 0xe37   : > { %v2578_v58 = vpop.f32.mrb[29].mxu1  ;;  %v1627_v2 = vsel %vm576_vm2, %v1612_v57, -inf }
 0xe38   : > { %v1615_v59 = vpop.f32.mrb[30].mxu1  ;;  %v2713_v58 = vld [vmem:[%s3417_s4 + $0x10] sm:$0xff]  }
 0xe39   : > { %v2579_v60 = vpop.f32.mrb[31].mxu1  ;;  %v2714_v59 = vld [vmem:[%s3417_s4 + $0x18] sm:$0xff]  }
 0xe3a   : > { %v1563_v61 = vpop.f32.mrb[32].mxu0 }
 0xe3b   : > { %v2572_v62 = vpop.f32.mrb[33].mxu0  ;;  %v1624_v63 = vsel %vm576_vm2, %v1563_v61, -inf }
 0xe3c   : > { %1625 = vmax.xlane.f32.xlu0 %v1624_v63  ;;  %v1566_v0 = vpop.f32.mrb[34].mxu0 }
 0xe3d   : > { %v2573_v1 = vpop.f32.mrb[35].mxu0 }
 0xe40   : > { %1628 = vmax.xlane.f32.xlu0 %v1627_v2 }
 0xe45   : > { %1666 = vrot.lane.b32.xlu1 %v1418_v32, %s3449_s24 }
 0xe50   : > { %v1620_v3 = vpop.xlane.xlu0 %1619 }
 0xe51   : > { %v1630_v4 = vsub.f32 %v1465_v47, %v1620_v3 }
 0xe53   : > { %v1634_v5 = vmul.f32 1.442695, %v1630_v4 }
 0xe55   : > { %2751 = vpow2.f32 %v1634_v5 }
 0xe5f   : > { %v2752_v6 = vpop.eup %2751 }
 0xe60   : > { %v1642_v7 = vsel %vm576_vm2, %v2752_v6, 0.0 }
 0xe69   : > { %1643 = vadd.xlane.f32.xlu1 %v1642_v7 }
 0xe7a   : > { %1762 = vrot.lane.b32.xlu1 %v1420_v35, %s3449_s24 }
 0xec1   : > { %v1623_v9 = vpop.xlane.xlu1 %1622 }
 0xec2   : > { %v1631_v10 = vsub.f32 %v1514_v52, %v1623_v9 }
 0xec4   : > { %v1636_v11 = vmul.f32 1.442695, %v1631_v10 }
 0xec5   : > { %v1667_v12 = vpop.permute.xlu1 %1666 }
 0xec6   : > { %2753 = vpow2.f32 %v1636_v11  ;;  %v1672_v13 = vsel %vm823_vm3, %v1667_v12, 0 }
 0xec7   : > { %2581 = vmatpush3.bf16.msra.mxu0 %v1672_v13 }
 0xec8   : > { %2592 = vmatprep.subr.bf16.mxu0 %v2839_v8 }
 0xec9   : > { %v1626_v16 = vpop.xlane.xlu0 %1625 }
 0xeca   : > { %v1632_v17 = vsub.f32 %v1563_v61, %v1626_v16 }
 0xecc   : > { %v1638_v19 = vmul.f32 1.442695, %v1632_v17 }
 0xecd   : > { %v1629_v18 = vpop.xlane.xlu0 %1628 }
 0xece   : > { %2755 = vpow2.f32 %v1638_v19  ;;  %v1633_v20 = vsub.f32 %v1612_v57, %v1629_v18  ;;  %v2362_v19 = vld [vmem:[%s3418_s5 + $0x1] ss:$0 sm:$0xff] }
 0xed0   : > { %v2754_v22 = vpop.eup %2753  ;;  %v1640_v23 = vmul.f32 1.442695, %v1633_v20 }
 0xed1   : > { %v1645_v24 = vsel %vm576_vm2, %v2754_v22, 0.0 }
 0xed2   : > { %2757 = vpow2.f32 %v1640_v23  ;;  %1646 = vadd.xlane.f32.xlu0 %v1645_v24 }
 0xed8   : > { %v2756_v30 = vpop.eup %2755 }
 0xed9   : > { %v1648_v28 = vsel %vm576_vm2, %v2756_v30, 0.0 }
 0xeda   : > { %1649 = vadd.xlane.f32.xlu1 %v1648_v28 }
 0xedc   : > { %v2758_v31 = vpop.eup %2757 }
 0xedd   : > { %v1651_v27 = vsel %vm576_vm2, %v2758_v31, 0.0 }
 0xede   : > { %1652 = vadd.xlane.f32.xlu0 %v1651_v27 }
 0xeeb   : > { %1810 = vrot.lane.b32.xlu1 %v3205_v39, %s3449_s24 }
 0xef4   : > { %1714 = vrot.lane.b32.xlu0 %v3200_v36, %s3449_s24  ;;  %s2214_s24 = scalar_lea.sflag [#allocation3], %s429_s21 }
 0xef6   : > { %v1644_v32 = vpop.xlane.xlu1 %1643 }
 0xef7   : > { %2759 = vrcp.f32 %v1644_v32 }
 0xefa   : > { %v1763_v35 = vpop.permute.xlu1 %1762 }
 0xefb   : > { %v1768_v38 = vsel %vm823_vm3, %v1763_v35, 0  ;;  %v2715_v35 = vld [vmem:[%s3420_s7 + $0x10] sm:$0xff]  }
 0xf01   : > { %v2760_v33 = vpop.eup %2759 }
 0xf02   : > { %v1658_v34 = vmul.f32 %v2760_v33, %v2752_v6 }
 0xf04   : > { %v1662_v37 = vpack.c.bf16 %v1658_v34, %v1658_v34 }
 0xf06   : > { %2583 = vmatmul.mubr.msk.bf16.vlgmr.msra.gmra.mrb[36].mxu0 %vm576_vm2, %v1662_v37  ;;  %v2716_v37 = vld [vmem:[%s3420_s7 + $0x18] sm:$0xff]  }
 0xf07   : > { %2593 = vmatpush3.bf16.msra.mxu0 %v1768_v38  ;;  %2594 = vmatprep.mubr.msk.bf16.mxu0 %vm2840_vm1, %v2839_v8 }
 0xf08   : > { %2604 = vmatprep.subr.bf16.mxu0 %v2839_v8 }
 0xf5f   : > { %v1647_v39 = vpop.xlane.xlu0 %1646 }
 0xf60   : > { %2761 = vrcp.f32 %v1647_v39 }
 0xf67   : > { %v1650_v40 = vpop.xlane.xlu1 %1649 }
 0xf68   : > { %2763 = vrcp.f32 %v1650_v40 }
 0xf6a   : > { %v2762_v36 = vpop.eup %2761 }
 0xf6b   : > { %v1653_v41 = vpop.xlane.xlu0 %1652  ;;  %v1659_v42 = vmul.f32 %v2762_v36, %v2754_v22  ;;  %v1811_v45 = vpop.permute.xlu1 %1810  ;;  %v3303_v36 = vld [vmem:[%s3419_s6 + $0x4] sm:$0xf] }
 0xf6c   : > { %2765 = vrcp.f32 %v1653_v41  ;;  %v1816_v49 = vsel %vm823_vm3, %v1811_v45, 0  ;;  %v1952_v41 = vrot.slane %v3303_v36, %v1106_v26  ;;  %v2719_v26 = vld [vmem:[%s3422_s9 + $0x50] sm:$0xff]  }
 0xf6d   : > { %v1663_v47 = vpack.c.bf16 %v1659_v42, %v1659_v42 }
 0xf6f   : > { %v1715_v43 = vpop.permute.xlu0 %1714 }
 0xf70   : > { %v1720_v44 = vsel %vm823_vm3, %v1715_v43, 0 }
 0xf71   : > { %2587 = vmatpush3.bf16.msra.mxu1 %v1720_v44  ;;  %v1957_v44 = vrot.slane %v3303_v36, %v1111_v29  ;;  %v2720_v29 = vld [vmem:[%s3422_s9 + $0x58] sm:$0xff]  }
 0xf72   : > { %v2764_v46 = vpop.eup %2763  ;;  %2598 = vmatprep.subr.bf16.mxu1 %v2839_v8 }
 0xf73   : > { %v1660_v48 = vmul.f32 %v2764_v46, %v2756_v30 }
 0xf74   : > { %2589 = vmatmul.mubr.msk.bf16.vlgmr.msra.gmra.mrb[32].mxu1 %vm576_vm2, %v1663_v47 }
 0xf75   : > { %2599 = vmatpush3.bf16.msra.mxu1 %v1816_v49  ;;  %v1664_v50 = vpack.c.bf16 %v1660_v48, %v1660_v48  ;;  %2600 = vmatprep.mubr.msk.bf16.mxu1 %vm2840_vm1, %v2839_v8  ;;  %v2718_v48 = vld [vmem:[%s3422_s9 + $0x48] sm:$0xff]   ;;  %v2721_v49 = vld [vmem:[%s3422_s9 + $0x60] sm:$0xff]  }
 0xf76   : > { %v2766_v51 = vpop.eup %2765  ;;  %2612 = vmatprep.subr.bf16.mxu1 %v2839_v8 }
 0xf77   : > { %v1661_v52 = vmul.f32 %v2766_v51, %v2758_v31  ;;  %2595 = vmatmul.mubr.msk.bf16.vlgmr.msra.gmra.mrb[40].mxu0 %vm576_vm2, %v1664_v50  ;;  %v2722_v50 = vld [vmem:[%s3422_s9 + $0x68] sm:$0xff]   ;;  %v2723_v51 = vld [vmem:[%s3422_s9 + $0x70] sm:$0xff]  }
 0xf78   : > { %2608 = vmatprep.mubr.msk.bf16.mxu0 %vm2840_vm1, %v2839_v8  ;;  %2605 = vmatpush3.bf16.msra.mxu0 %v2713_v58 }
 0xf79   : > { %v1665_v53 = vpack.c.bf16 %v1661_v52, %v1661_v52  ;;  %2606 = vmatprep.subr.bf16.mxu0 %v2839_v8  ;;  %v2724_v52 = vld [vmem:[%s3422_s9 + $0x78] sm:$0xff]  }
 0xf7c   : > { %2601 = vmatmul.mubr.msk.bf16.vlgmr.msra.gmra.mrb[36].mxu1 %vm576_vm2, %v1665_v53  ;;  %2607 = vmatpush3.bf16.msra.mxu0 %v2714_v59  ;;  %v2366_v53 = vld [vmem:[%s3421_s8 + $0x1] ss:$0 sm:$0xff] }
 0xf7d   : > { %2616 = vmatprep.mubr.msk.bf16.mxu1 %vm2840_vm1, %v2839_v8  ;;  %2620 = vmatprep.subr.bf16.mxu0 %v2839_v8 }
 0xf7e   : > { %2613 = vmatpush3.bf16.msra.mxu1 %v2715_v35 }
 0xf7f   : > { %2614 = vmatprep.subr.bf16.mxu1 %v2839_v8 }
 0xf82   : > { %2615 = vmatpush3.bf16.msra.mxu1 %v2716_v37  ;;  %v2154_v37 = vld [vmem:[%s3425_s12] sm:$0x1] }
 0xf83   : > { %2640 = vmatprep.subr.bf16.mxu1 %v2839_v8 }
 0xfd9   : > { %v1708_v54 = vpop.f32.mrb[36].mxu0 }
 0xfda   : > { %v2584_v55 = vpop.f32.mrb[37].mxu0 }
 0xfdb   : > { %v1711_v56 = vpop.f32.mrb[38].mxu0 }
 0xfdc   : > { %v2585_v57 = vpop.f32.mrb[39].mxu0 }
0x1047   : > { %v1756_v60 = vpop.f32.mrb[32].mxu1 }
0x1048   : > { %1859 = vrot.lane.b32.xlu0 %v1756_v60, %s3450_s22  ;;  %v2590_v61 = vpop.f32.mrb[33].mxu1  ;;  %s2226_s22 = sshll.u32 %s430_s16, 4  ;;  %s3373_s22 = int_to_ptr.vmem [resolvable:$true] %s2226_s22 }
0x1049   : > { %v1759_v62 = vpop.f32.mrb[34].mxu1  ;;  %s2775_s20 = scalar_lea.vmem %s3373_s22, 16  ;;  %p2782_p0 = scmp.lt.s32.totalorder %s3373_s22, %s2780_s1 }
0x104a   : > { %v2591_v63 = vpop.f32.mrb[35].mxu1  ;;  %v1804_v0 = vpop.f32.mrb[40].mxu0  ;;  %p2776_p11 = scmp.ne.s32.totalorder %s3373_s22, %s2775_s20  ;;  %p2783_p1 = scmp.lt.s32.totalorder %s2781_s2, %s2775_s20 }
0x104b   : > { %1863 = vrot.lane.b32.xlu1 %v1804_v0, %s3451_s30  ;;  %v2596_v1 = vpop.f32.mrb[41].mxu0 }
0x104c   : > { %v1807_v2 = vpop.f32.mrb[42].mxu0  ;;  %p2777_p12 = pnand %p2776_p11, %p2958_p5  ;;  %p2784_p2 = por %p2783_p1, %p2782_p0 }
0x104d   : > { %v2597_v3 = vpop.f32.mrb[43].mxu0 }
0x104e   : > { %p2778_p13 = pneg %p2777_p12 }
0x104f   : > { %v1852_v4 = vpop.f32.mrb[36].mxu1 }
0x1050   : > { %1867 = vrot.lane.b32.xlu0 %v1852_v4, %s3452_s15  ;;  %v2602_v5 = vpop.f32.mrb[37].mxu1  ;;  %p2785_p3 = pnand %p2784_p2, %p2778_p13 }
0x1051   : > { %v1855_v6 = vpop.f32.mrb[38].mxu1  ;;  %v2370_v5 = vld [vmem:[%s3423_s10 + $0x1] ss:$0 sm:$0xff] }
0x1052   : > { %v2603_v7 = vpop.f32.mrb[39].mxu1 }
0x10ba   : > { %v1860_v9 = vpop.permute.xlu0 %1859 }
0x10bb   : > { %v1870_v11 = vsel %vm576_vm2, %v1708_v54, %v1860_v9 }
0x10bd   : > { %v1864_v10 = vpop.permute.xlu1 %1863 }
0x10be   : > { %v1871_v12 = vsel %vm1024_vm4, %v1870_v11, %v1864_v10 }
0x10c2   : > { %v1868_v13 = vpop.permute.xlu0 %1867 }
0x10c3   : > { %v1872_v16 = vsel %vm1026_vm5, %v1871_v12, %v1868_v13 }
0x10c4   : > { %v1873_v17 = vpack.c.bf16 %v1872_v16, %v1872_v16 }
0x10c6   : > { %2609 = vmatmul.mubr.msk.bf16.vlgmr.msra.gmra.mrb[44].mxu0 %vm439_vm0, %v1873_v17 }
0x10c7   : > { %2636 = vmatprep.mubr.msk.bf16.mxu0 %vm2840_vm1, %v2839_v8 }
0x1199   : > { %v1929_v18 = vpop.f32.mrb[44].mxu0 }
0x119a   : > { %v1930_v20 = vadd.f32 %v2362_v19, %v1929_v18  ;;  %v2610_v22 = vpop.f32.mrb[45].mxu0 }
0x119b   : > { %v1932_v23 = vpop.f32.mrb[46].mxu0  ;;  %v2725_v22 = vld [vmem:[%s3424_s11] sm:$0xff]  }
0x119c   : > { %v2611_v24 = vpop.f32.mrb[47].mxu0  ;;  %v1935_v30 = vadd.f32 %v1930_v20, %v3186_v21  ;;  %v2717_v21 = vld [vmem:[%s3422_s9 + $0x40] sm:$0xff]   ;;  %v2726_v23 = vld [vmem:[%s3424_s11 + $0x8] sm:$0xff]  }
0x119d   : > { %2621 = vmatpush3.bf16.msra.mxu0 %v2717_v21 }
0x119e   : > { %v1936_v28 = vsel %vm439_vm0, %v1935_v30, 0.0  ;;  %2622 = vmatprep.subr.bf16.mxu0 %v2839_v8 }
0x119f   : > { %1937 = vadd.xlane.f32.xlu1 %v1936_v28 }
0x11a1   : > { %2623 = vmatpush3.bf16.msra.mxu0 %v2718_v48 }
0x11a2   : > { %2624 = vmatprep.subr.bf16.mxu0 %v2839_v8 }
0x11a5   : > { %2625 = vmatpush3.bf16.msra.mxu0 %v2719_v26 }
0x11a6   : > { %2626 = vmatprep.subr.bf16.mxu0 %v2839_v8 }
0x11a9   : > { %2627 = vmatpush3.bf16.msra.mxu0 %v2720_v29 }
0x11aa   : > { %2628 = vmatprep.subr.bf16.mxu0 %v2839_v8 }
0x11ad   : > { %2629 = vmatpush3.bf16.msra.mxu0 %v2721_v49 }
0x11ae   : > { %2630 = vmatprep.subr.bf16.mxu0 %v2839_v8 }
0x11b1   : > { %2631 = vmatpush3.bf16.msra.mxu0 %v2722_v50 }
0x11b2   : > { %2632 = vmatprep.subr.bf16.mxu0 %v2839_v8 }
0x11b5   : > { %2633 = vmatpush3.bf16.msra.mxu0 %v2723_v51 }
0x11b6   : > { %2634 = vmatprep.subr.bf16.mxu0 %v2839_v8 }
0x11b9   : > { %2635 = vmatpush3.bf16.msra.mxu0 %v2724_v52 }
0x122c   : > { %v1938_v31 = vpop.xlane.xlu1 %1937 }
0x122d   : > { %v1939_v27 = vmul.f32 0.03125, %v1938_v31  ;;  %v2142_v31 = vrot.slane %v3303_v36, %v1296_v14 }
0x122f   : > { %v1940_v32 = vsub.f32 %v1935_v30, %v1939_v27 }
0x1231   : > { %v1941_v33 = vmul.f32 %v1940_v32, %v1940_v32 }
0x1233   : > { %v1942_v34 = vsel %vm439_vm0, %v1941_v33, 0.0  ;;  %v2147_v33 = vrot.slane %v3303_v36, %v1301_v15 }
0x1234   : > { %1943 = vadd.xlane.f32.xlu0 %v1942_v34 }
0x12c1   : > { %v1944_v38 = vpop.xlane.xlu0 %1943 }
0x12c2   : > { %v1945_v39 = vmul.f32 0.03125, %v1944_v38 }
0x12c4   : > { %v1946_v40 = vadd.f32 1e-12, %v1945_v39 }
0x12c6   : > { %2767 = vrsqrt.f32 %v1946_v40 }
0x12d0   : > { %v2768_v42 = vpop.eup %2767 }
0x12d1   : > { %v1948_v43 = vmul.f32 %v2768_v42, %v1940_v32 }
0x12d3   : > { %v1953_v45 = vmul.f32 %v1952_v41, %v1948_v43 }
0x12d5   : > { %v1958_v46 = vadd.f32 %v1957_v44, %v1953_v45 }
0x12d7   : > { %v1959_v47 = vpack.c.bf16 %v1958_v46, %v1958_v46 }
0x12d9   : > { %2617 = vmatmul.mubr.msk.bf16.vlgmr.msra.gmra.mrb[40].mxu1 %vm439_vm0, %v1959_v47 }
0x12da   : > { %2644 = vmatprep.mubr.msk.bf16.mxu1 %vm2840_vm1, %v2839_v8  ;;  %2641 = vmatpush3.bf16.msra.mxu1 %v2725_v22 }
0x12db   : > { %2642 = vmatprep.subr.bf16.mxu1 %v2839_v8 }
0x12de   : > { %2643 = vmatpush3.bf16.msra.mxu1 %v2726_v23 }
0x13ac   : > { %v2015_v54 = vpop.f32.mrb[40].mxu1 }
0x13ad   : > { %v2016_v55 = vadd.f32 %v2366_v53, %v2015_v54  ;;  %v2618_v56 = vpop.f32.mrb[41].mxu1 }
0x13ae   : > { %v2018_v57 = vpop.f32.mrb[42].mxu1 }
0x13af   : > { %v2022_v58 = vmul.f32 0.044715, %v2016_v55  ;;  %v2619_v59 = vpop.f32.mrb[43].mxu1  ;;  %v2021_v1 = vmul.f32 0.5, %v2016_v55 }
0x13b1   : > { %v2023_v60 = vmul.f32 %v2022_v58, %v2016_v55 }
0x13b3   : > { %v2024_v61 = vmul.f32 %v2023_v60, %v2016_v55 }
0x13b5   : > { %v2025_v62 = vadd.f32 %v2024_v61, %v2016_v55 }
0x13b7   : > { %v2026_v63 = vmul.f32 0.7978846, %v2025_v62 }
0x13b9   : > { %2769 = vtanh.f32 %v2026_v63 }
0x13c3   : > { %v2770_v0 = vpop.eup %2769 }
0x13c4   : > { %v2028_v2 = vadd.f32 1.0, %v2770_v0 }
0x13c6   : > { %v2029_v3 = vmul.f32 %v2028_v2, %v2021_v1 }
0x13c8   : > { %v2030_v4 = vpack.c.bf16 %v2029_v3, %v2029_v3 }
0x13ca   : > { %2637 = vmatmul.mubr.bf16.vlgmr.msra.gmra.mrb[48].mxu0 %v2030_v4 }
0x149d   : > { %v2119_v6 = vpop.f32.mrb[48].mxu0 }
0x149e   : > { %v2120_v7 = vadd.f32 %v2370_v5, %v2119_v6  ;;  %v2638_v9 = vpop.f32.mrb[49].mxu0 }
0x149f   : > { %v2122_v10 = vpop.f32.mrb[50].mxu0 }
0x14a0   : > { %v2639_v11 = vpop.f32.mrb[51].mxu0  ;;  %v2125_v12 = vadd.f32 %v2120_v7, %v1958_v46 }
0x14a2   : > { %v2126_v13 = vsel %vm439_vm0, %v2125_v12, 0.0 }
0x14a3   : > { %2127 = vadd.xlane.f32.xlu0 %v2126_v13 }
0x1530   : > { %v2128_v16 = vpop.xlane.xlu0 %2127 }
0x1531   : > { %v2129_v17 = vmul.f32 0.03125, %v2128_v16 }
0x1533   : > { %v2130_v19 = vsub.f32 %v2125_v12, %v2129_v17 }
0x1535   : > { %v2131_v18 = vmul.f32 %v2130_v19, %v2130_v19 }
0x1537   : > { %v2132_v20 = vsel %vm439_vm0, %v2131_v18, 0.0 }
0x1538   : > { %2133 = vadd.xlane.f32.xlu1 %v2132_v20 }
0x15c5   : > { %v2134_v24 = vpop.xlane.xlu1 %2133 }
0x15c6   : > { %v2135_v30 = vmul.f32 0.03125, %v2134_v24 }
0x15c8   : > { %v2136_v28 = vadd.f32 1e-12, %v2135_v30 }
0x15ca   : > { %2771 = vrsqrt.f32 %v2136_v28 }
0x15d4   : > { %v2772_v27 = vpop.eup %2771 }
0x15d5   : > { %v2138_v32 = vmul.f32 %v2772_v27, %v2130_v19 }
0x15d7   : > { %v2143_v34 = vmul.f32 %v2142_v31, %v2138_v32 }
0x15d9   : > { %v2148_v35 = vadd.f32 %v2147_v33, %v2143_v34 }
0x15db   : > { %v2149_v8 = vpack.c.bf16 %v2148_v35, %v2148_v35 }
0x15dd   : > { %2645 = vmatmul.mubr.msk.bf16.vlgmr.msra.gmra.mrb[44].mxu1 %vm439_vm0, %v2149_v8 }
0x16b0   : > { %v2204_v21 = vpop.f32.mrb[44].mxu1 }
0x16b1   : > { %v2205_v38 = vadd.f32 %v2204_v21, %v2154_v37  ;;  %v2646_v39 = vpop.f32.mrb[45].mxu1 }
0x16b2   : > { %v2207_v14 = vpop.f32.mrb[46].mxu1 }
0x16b3   : > { %2773 = vtanh.f32 %v2205_v38  ;;  %v2647_v40 = vpop.f32.mrb[47].mxu1 }
0x16bd   : > { %v2774_v25 = vpop.eup %2773 }
0x16be   : > { %2212 = vst.msk [vmem:[%s430_s16] sm:$0x1] %vm2211_vm6, %v2774_v25 }
0x16bf   : > { %2788 = shalt.err (!%p2785_p3)
}
0x16c0   : > { %s2789_s21 = scalar_lea.hbm %s3371_s0, 16  ;;  %s2793_s30 = scalar_lea.hbm %s3426_s13, 32 }
0x16c1   : > { %p2790_p4 = scmp.ne.s32.totalorder %s3371_s0, %s2789_s21  ;;  %p2794_p9 = scmp.lt.u32.totalorder %s3371_s0, %s3426_s13 }
0x16c2   : > { %p2795_p10 = scmp.lt.u32.totalorder %s2793_s30, %s2789_s21  ;;  %p2797_p12 = scmp.lt.u32.totalorder %s2789_s21, %s3371_s0 }
0x16c3   : > { %p2791_p7 = pnand %p2790_p4, %p2958_p5 }
0x16c4   : > { %p2796_p11 = por %p2795_p10, %p2794_p9 }
0x16c5   : > { %p2792_p8 = pneg %p2791_p7 }
0x16c6   : > { %p2798_p13 = por %p2797_p12, %p2796_p11 }
0x16c8   : > { %p2799_p0 = pnand %p2798_p13, %p2792_p8 }
0x16ca   : > { %2802 = shalt.err (!%p2799_p0)
}
0x16cb   : > { %2648 = dma.vmem_to_hbm [thread:$0]  (%p2958_p5), %s3373_s22, 16, %s3371_s0, %s2214_s24  }
0x16cc PF: > { %p2654_p1 = scmp.ge.s32.totalorder %s2837_s28, 2  ;;  %s2238_s2 = sand.u32 1, %s2825_s25  }
0x16cd   : > { %s2239_s20 = scalar_lea.sflag [#allocation3], %s2238_s2 }
0x16ce   : > { %p2651_p2 = pnand %p2654_p1, %p2962_p6 }
0x16d0   : > { %2820 = dma.done.wait (!%p2651_p2), %s2239_s20, 16  }
0x16d1   : > { %2822 = vsyncadd (!%p2651_p2), %s2239_s20, 4294967280  ;;  %p23_p3 = scmp.ge.s32.totalorder %s2945_s14, 4   ;;  %s3453_s25 = smov %s2829_s26 }
0x16d2   : > { %s3454_s26 = smov %s2833_s27  ;;  %s3455_s27 = smov %s2956_s17 }
0x16d3   : > { %s3456_s28 = smov %s2945_s14  ;;  %25 = sbr.rel (!%p23_p3) target bundleno = 7 (0x7), region = 116 }
0x16da   :  { %2243 = vsyncpa [#allocation3], 1 }
0x16db   :  { %2245 = vsyncpa [#allocation3 + $0x1], 1 }

</bundles_post_ra>
